<compile_context>
chip_gen: v7x
topology: tpu7x:2x2x1
jax: 0.10.0
libtpu: 0.0.40
codegen_flags: <defaults>
</compile_context>

<pallas_src>
import numpy as np

import jax
import jax.numpy as jnp
from jax import lax
from jax.experimental import pallas as pl
from jax.experimental.pallas import tpu as pltpu


# --------------------------------------------------------------------------- #
# Fused kernel: conv1+ReLU+pool1 -> conv2+ReLU+pool2 -> fc1+ReLU -> fc2
# --------------------------------------------------------------------------- #
def _critic_kernel(xs_ref, sc_ref, w1_ref, b1_ref, w2_ref, b2_ref,
                   wfa_ref, wfs_ref, bf1_ref, wf2_ref, bf2_ref, o_ref):
    f32 = jnp.float32
    bf16 = jnp.bfloat16

    w1m = w1_ref[...]                       # (256, 512) bf16, cols = (parity, x_pool, oc)
    b1 = b1_ref[...]                        # (1, 256) f32
    acc = [None, None]                      # conv2 accumulators for kept rows y2 = 0, 1

    # Interleaved conv1(+ReLU+pool1) -> conv2 accumulation, one pooled row at a time.
    for yp in range(4):
        ra = xs_ref[2 * yp]                 # (TB, 256) bf16 im2col strip, conv row 2*yp
        rb = xs_ref[2 * yp + 1]             # (TB, 256) bf16 im2col strip, conv row 2*yp+1
        ya = jnp.dot(ra, w1m, preferred_element_type=f32)        # (TB, 512)
        yb = jnp.dot(rb, w1m, preferred_element_type=f32)        # (TB, 512)
        # 2x2 pool = 4-way elementwise max; bias/ReLU commute with the max.
        m = jnp.maximum(jnp.maximum(ya[:, :256], ya[:, 256:]),
                        jnp.maximum(yb[:, :256], yb[:, 256:]))
        p1 = jnp.maximum(m + b1, 0.0).astype(bf16)               # (TB, 256) pooled row yp

        # conv2 output row y2 consumes pooled rows y2..y2+2 with tap dy = yp - y2.
        for y2 in range(2):
            dy = yp - y2
            if 0 <= dy <= 2:
                c = jnp.dot(p1, w2_ref[dy], preferred_element_type=f32)   # (TB, 256)
                acc[y2] = c if acc[y2] is None else acc[y2] + c

    # conv2 2x2 pool: max over y2 in {0,1} and the two 128-wide x2 column blocks.
    m2 = jnp.maximum(jnp.maximum(acc[0][:, :128], acc[0][:, 128:]),
                     jnp.maximum(acc[1][:, :128], acc[1][:, 128:]))
    av_out = jnp.maximum(m2 + b2_ref[...], 0.0).astype(bf16)     # (TB, 128)

    # Linear(128+S, 64) + ReLU without materializing the concat.
    t1 = (jnp.dot(av_out, wfa_ref[...], preferred_element_type=f32)
          + jnp.dot(sc_ref[...], wfs_ref[...], preferred_element_type=f32)
          + bf1_ref[...])
    t1 = jnp.maximum(t1, 0.0)                                    # (TB, 64) f32

    # Linear(64, 1) as a VPU/XLU lane reduction (an N=1 MXU matmul would be wasted).
    v = jnp.sum(t1 * wf2_ref[...], axis=-1, keepdims=True) + bf2_ref[...]
    o_ref[...] = v.astype(o_ref.dtype)                           # (TB, 1)


# --------------------------------------------------------------------------- #
# Host wrapper
# --------------------------------------------------------------------------- #
def critic_forward(params, av, scalar_obs, *, block_b=None):
    """av: (B, 6, 13, 13) NCHW; scalar_obs: (B, S) -> (B, 1) float32."""
    B = av.shape[0]
    s_in = scalar_obs.shape[-1]

    def r16(n):
        return ((n + 15) // 16) * 16

    if block_b is None:
        if B <= 16:
            block_b = r16(B)
        else:
            # >=2 grid steps so both v7x TensorCores get work on the "parallel"
            # axis; <=512 rows/tile amortizes the ~0.35us/step overhead and stays
            # well inside v7x's 64 MiB VMEM (strip tile is 4 KiB/row in bf16).
            block_b = min(512, r16(pl.cdiv(B, 2)))
    n_blk = pl.cdiv(B, block_b)
    Bp = n_blk * block_b

    # im2col row strips for conv1, cast to bf16 BEFORE the ~2.4x duplication.
    # Only the 8 conv rows feeding pooled rows 0..3 (the ones conv2 consumes).
    # Last dim zero-padded 234 -> 256 for exact K tiles.
    x = jnp.transpose(av, (0, 2, 3, 1)).astype(jnp.bfloat16)           # NCHW -> NHWC
    strips = jnp.stack([x[:, y:y + 3] for y in range(8)], axis=0)       # (8,B,3,13,6)
    strips = strips.reshape(8, B, 3 * 13 * 6)
    strips = jnp.pad(strips, ((0, 0), (0, Bp - B), (0, 256 - 234)))     # (8,Bp,256)
    scal = scalar_obs.astype(jnp.bfloat16)
    if Bp != B:
        scal = jnp.pad(scal, ((0, Bp - B), (0, 0)))

    weights = (params["w1m"], params["b1r"], params["w2m"], params["b2r"],
               params["fc1_av"], params["fc1_sc"], params["fc1_b"],
               params["fc2_w"], params["fc2_b"])

    def _resident(a):                      # full-block weight, constant index_map
        nd = a.ndim
        return pl.BlockSpec(a.shape, lambda i, nd=nd: (0,) * nd)

    macs = 8 * 256 * 512 + 6 * 256 * 256 + (128 + s_in) * 64 + 64
    bytes_accessed = int(
        strips.size * strips.dtype.itemsize + scal.size * scal.dtype.itemsize
        + 4 * Bp + sum(int(w.size) * w.dtype.itemsize for w in weights))
    cost = pl.CostEstimate(flops=2 * Bp * macs, transcendentals=0,
                           bytes_accessed=bytes_accessed)

    out = pl.pallas_call(
        _critic_kernel,
        grid=(n_blk,),
        in_specs=[
            pl.BlockSpec((8, block_b, 256), lambda i: (0, i, 0)),
            pl.BlockSpec((block_b, s_in), lambda i: (i, 0)),
            *[_resident(w) for w in weights],
        ],
        out_specs=pl.BlockSpec((block_b, 1), lambda i: (i, 0)),
        out_shape=jax.ShapeDtypeStruct((Bp, 1), jnp.float32),
        compiler_params=pltpu.CompilerParams(
            dimension_semantics=("parallel",),
            vmem_limit_bytes=48 * 1024 * 1024),
        cost_estimate=cost,
    )(strips, scal, *weights)
    return out[:B]


# --------------------------------------------------------------------------- #
# Parameters (PyTorch layout) and init-time packing into GEMM-ready matrices
# --------------------------------------------------------------------------- #
def init_params(scalar_in=41):
    key = jax.random.PRNGKey(42)
    ks = jax.random.split(key, 8)

    def u(k, shape, fan_in):
        bound = 1.0 / jnp.sqrt(fan_in)
        return jax.random.uniform(k, shape, jnp.float32, -bound, bound)

    return {
        "conv1_w": u(ks[0], (64, 6, 3, 3), 6 * 9),
        "conv1_b": u(ks[1], (64,), 6 * 9),
        "conv2_w": u(ks[2], (128, 64, 3, 3), 64 * 9),
        "conv2_b": u(ks[3], (128,), 64 * 9),
        "fc1_w": u(ks[4], (64, 128 + scalar_in), 128 + scalar_in),
        "fc1_b": u(ks[5], (64,), 128 + scalar_in),
        "fc2_w": u(ks[6], (1, 64), 64),
        "fc2_b": u(ks[7], (1,), 64),
    }


def prepare_params(p):
    """Pack PyTorch-layout weights into the GEMM-ready (mostly bf16) kernel form."""
    w1 = np.asarray(p["conv1_w"], np.float32)                   # (64, 6, 3, 3) OIHW
    b1 = np.asarray(p["conv1_b"], np.float32)
    # (256, 512): rows = (dy, xx, c) of a 3x13x6 strip (zero-padded 234->256),
    # cols = (parity, x_pool, out_ch) with conv output x = 2*x_pool + parity.
    w1m = np.zeros((256, 512), np.float32)
    for parity in range(2):
        for xp in range(4):
            x_out = 2 * xp + parity
            c0 = parity * 256 + xp * 64
            for dy in range(3):
                for dx in range(3):
                    r0 = dy * 78 + (x_out + dx) * 6
                    w1m[r0:r0 + 6, c0:c0 + 64] = w1[:, :, dy, dx].T
    b1r = np.tile(b1, 4)[None, :]                               # (1, 256)

    w2 = np.asarray(p["conv2_w"], np.float32)                   # (128, 64, 3, 3)
    b2 = np.asarray(p["conv2_b"], np.float32)
    # (3, 256, 256): [dy], rows = (x_in 0..3, c), cols = (x2 0..1, out_ch 0..127).
    w2m = np.zeros((3, 256, 256), np.float32)
    for dy in range(3):
        for x2 in range(2):
            for dx in range(3):
                xin = x2 + dx
                w2m[dy, xin * 64:(xin + 1) * 64, x2 * 128:(x2 + 1) * 128] = \
                    w2[:, :, dy, dx].T
    b2r = b2[None, :]                                           # (1, 128)

    fc1_w = np.asarray(p["fc1_w"], np.float32)                  # (64, 128+S)
    bf16 = jnp.bfloat16
    return {
        "w1m": jnp.asarray(w1m, bf16),
        "b1r": jnp.asarray(b1r, jnp.float32),
        "w2m": jnp.asarray(w2m, bf16),
        "b2r": jnp.asarray(b2r, jnp.float32),
        "fc1_av": jnp.asarray(np.ascontiguousarray(fc1_w[:, :128].T), bf16),  # (128, 64)
        "fc1_sc": jnp.asarray(np.ascontiguousarray(fc1_w[:, 128:].T), bf16),  # (S, 64)
        "fc1_b": jnp.asarray(np.asarray(p["fc1_b"], np.float32)[None, :]),    # (1, 64)
        "fc2_w": jnp.asarray(np.asarray(p["fc2_w"], np.float32)),             # (1, 64)
        "fc2_b": jnp.asarray(np.asarray(p["fc2_b"], np.float32).reshape(1, 1)),
    }


# --------------------------------------------------------------------------- #
# Plain-JAX reference (validation only)
# --------------------------------------------------------------------------- #
def reference_forward(raw, av, scalar_obs):
    hi = lax.Precision.HIGHEST
    x = jnp.transpose(av, (0, 2, 3, 1))
    k1 = jnp.transpose(raw["conv1_w"], (2, 3, 1, 0))
    y = lax.conv_general_dilated(x, k1, (1, 1), "VALID",
                                 dimension_numbers=("NHWC", "HWIO", "NHWC"),
                                 precision=hi)
    y = jax.nn.relu(y + raw["conv1_b"])
    b = y.shape[0]
    y = y[:, :10, :10, :].reshape(b, 5, 2, 5, 2, 64).max(axis=(2, 4))
    k2 = jnp.transpose(raw["conv2_w"], (2, 3, 1, 0))
    y = lax.conv_general_dilated(y, k2, (1, 1), "VALID",
                                 dimension_numbers=("NHWC", "HWIO", "NHWC"),
                                 precision=hi)
    y = jax.nn.relu(y + raw["conv2_b"])
    y = y[:, :2, :2, :].reshape(b, 1, 2, 1, 2, 128).max(axis=(2, 4)).reshape(b, 128)
    cat = jnp.concatenate([y, scalar_obs], axis=-1)
    t = jax.nn.relu(jnp.dot(cat, raw["fc1_w"].T, precision=hi) + raw["fc1_b"])
    return jnp.dot(t, raw["fc2_w"].T, precision=hi) + raw["fc2_b"]


# --------------------------------------------------------------------------- #
# Main
# --------------------------------------------------------------------------- #
if __name__ == "__main__":
    B, SCALAR_IN = 2, 41
    key = jax.random.PRNGKey(0)
    k_av, k_sc = jax.random.split(key)
    av = jax.random.normal(k_av, (B, 6, 13, 13), jnp.float32)
    scalar_obs = jax.random.normal(k_sc, (B, SCALAR_IN), jnp.float32)

    raw = init_params(SCALAR_IN)
    params = prepare_params(raw)        # weight packing (incl. bf16 cast) at init time

    out = jax.jit(critic_forward)(params, av, scalar_obs)
    out = jax.block_until_ready(out)
    assert out.shape == (B, 1) and out.dtype == jnp.float32

    ref = reference_forward(raw, av, scalar_obs)
    # bf16 MXU operands with f32 accumulation: slightly looser atol than pure f32.
    np.testing.assert_allclose(np.asarray(out), np.asarray(ref),
                               rtol=5e-2, atol=1e-2)
    print("KERNEL_OK")
</pallas_src>

<mosaic_0001>
module attributes {stable_mosaic.version = 11 : i64} {
  func.func @_critic_kernel(%arg0: i32, %arg1: memref<8x16x256xbf16, #tpu.memory_space<vmem>>, %arg2: memref<16x41xbf16, #tpu.memory_space<vmem>>, %arg3: memref<256x512xbf16, #tpu.memory_space<vmem>>, %arg4: memref<1x256xf32, #tpu.memory_space<vmem>>, %arg5: memref<3x256x256xbf16, #tpu.memory_space<vmem>>, %arg6: memref<1x128xf32, #tpu.memory_space<vmem>>, %arg7: memref<128x64xbf16, #tpu.memory_space<vmem>>, %arg8: memref<41x64xbf16, #tpu.memory_space<vmem>>, %arg9: memref<1x64xf32, #tpu.memory_space<vmem>>, %arg10: memref<1x64xf32, #tpu.memory_space<vmem>>, %arg11: memref<1x1xf32, #tpu.memory_space<vmem>>, %arg12: memref<16x1xf32, #tpu.memory_space<vmem>>) attributes {dimension_semantics = [#tpu.dimension_semantics<parallel>], iteration_bounds = array<i64: 1>, scalar_prefetch = 0 : i64, scratch_operands = 0 : i64, tpu.core_type = #tpu.core_type<tc>, window_params = [{transform_indices = @transform_0, window_bounds = array<i64: 8, 16, 256>}, {transform_indices = @transform_1, window_bounds = array<i64: 16, 41>}, {pipeline_mode = #tpu.pipeline_mode<synchronous>, transform_indices = @transform_2, window_bounds = array<i64: 256, 512>}, {pipeline_mode = #tpu.pipeline_mode<synchronous>, transform_indices = @transform_3, window_bounds = array<i64: 1, 256>}, {pipeline_mode = #tpu.pipeline_mode<synchronous>, transform_indices = @transform_4, window_bounds = array<i64: 3, 256, 256>}, {pipeline_mode = #tpu.pipeline_mode<synchronous>, transform_indices = @transform_5, window_bounds = array<i64: 1, 128>}, {pipeline_mode = #tpu.pipeline_mode<synchronous>, transform_indices = @transform_6, window_bounds = array<i64: 128, 64>}, {pipeline_mode = #tpu.pipeline_mode<synchronous>, transform_indices = @transform_7, window_bounds = array<i64: 41, 64>}, {pipeline_mode = #tpu.pipeline_mode<synchronous>, transform_indices = @transform_8, window_bounds = array<i64: 1, 64>}, {pipeline_mode = #tpu.pipeline_mode<synchronous>, transform_indices = @transform_9, window_bounds = array<i64: 1, 64>}, {pipeline_mode = #tpu.pipeline_mode<synchronous>, transform_indices = @transform_10, window_bounds = array<i64: 1, 1>}, {transform_indices = @transform_11, window_bounds = array<i64: 16, 1>}]} {
    %c0 = arith.constant 0 : index
    %c0_0 = arith.constant 0 : index
    %0 = vector.load %arg3[%c0, %c0_0] : memref<256x512xbf16, #tpu.memory_space<vmem>>, vector<256x512xbf16>
    %c0_1 = arith.constant 0 : index
    %c0_2 = arith.constant 0 : index
    %1 = vector.load %arg4[%c0_1, %c0_2] : memref<1x256xf32, #tpu.memory_space<vmem>>, vector<1x256xf32>
    %c0_3 = arith.constant 0 : index
    %c0_4 = arith.constant 0 : index
    %c0_5 = arith.constant 0 : index
    %2 = vector.load %arg1[%c0_3, %c0_4, %c0_5] : memref<8x16x256xbf16, #tpu.memory_space<vmem>>, vector<1x16x256xbf16>
    %3 = vector.shape_cast %2 : vector<1x16x256xbf16> to vector<16x256xbf16>
    %c1 = arith.constant 1 : index
    %c0_6 = arith.constant 0 : index
    %c0_7 = arith.constant 0 : index
    %4 = vector.load %arg1[%c1, %c0_6, %c0_7] : memref<8x16x256xbf16, #tpu.memory_space<vmem>>, vector<1x16x256xbf16>
    %5 = vector.shape_cast %4 : vector<1x16x256xbf16> to vector<16x256xbf16>
    %cst = arith.constant dense<0.000000e+00> : vector<16x512xf32>
    %6 = tpu.matmul %3, %0, %cst {dimension_numbers = #tpu.dot_dimension_numbers<[1], [0], [0], [1], [0, 0, 1, 1], [], []>} : vector<16x256xbf16>, vector<256x512xbf16>, vector<16x512xf32> -> vector<16x512xf32>
    %cst_8 = arith.constant dense<0.000000e+00> : vector<16x512xf32>
    %7 = tpu.matmul %5, %0, %cst_8 {dimension_numbers = #tpu.dot_dimension_numbers<[1], [0], [0], [1], [0, 0, 1, 1], [], []>} : vector<16x256xbf16>, vector<256x512xbf16>, vector<16x512xf32> -> vector<16x512xf32>
    %8 = vector.extract_strided_slice %6 {offsets = [0, 0], sizes = [16, 256], strides = [1, 1]} : vector<16x512xf32> to vector<16x256xf32>
    %9 = vector.extract_strided_slice %6 {offsets = [0, 256], sizes = [16, 256], strides = [1, 1]} : vector<16x512xf32> to vector<16x256xf32>
    %10 = arith.maximumf %8, %9 : vector<16x256xf32>
    %11 = vector.extract_strided_slice %7 {offsets = [0, 0], sizes = [16, 256], strides = [1, 1]} : vector<16x512xf32> to vector<16x256xf32>
    %12 = vector.extract_strided_slice %7 {offsets = [0, 256], sizes = [16, 256], strides = [1, 1]} : vector<16x512xf32> to vector<16x256xf32>
    %13 = arith.maximumf %11, %12 : vector<16x256xf32>
    %14 = arith.maximumf %10, %13 : vector<16x256xf32>
    %15 = vector.broadcast %1 : vector<1x256xf32> to vector<16x256xf32>
    %16 = arith.addf %14, %15 : vector<16x256xf32>
    %cst_9 = arith.constant 0.000000e+00 : f32
    %17 = vector.broadcast %cst_9 : f32 to vector<16x256xf32>
    %18 = arith.maximumf %16, %17 : vector<16x256xf32>
    %19 = arith.truncf %18 : vector<16x256xf32> to vector<16x256xbf16>
    %c0_10 = arith.constant 0 : index
    %c0_11 = arith.constant 0 : index
    %c0_12 = arith.constant 0 : index
    %20 = vector.load %arg5[%c0_10, %c0_11, %c0_12] : memref<3x256x256xbf16, #tpu.memory_space<vmem>>, vector<1x256x256xbf16>
    %21 = vector.shape_cast %20 : vector<1x256x256xbf16> to vector<256x256xbf16>
    %cst_13 = arith.constant dense<0.000000e+00> : vector<16x256xf32>
    %22 = tpu.matmul %19, %21, %cst_13 {dimension_numbers = #tpu.dot_dimension_numbers<[1], [0], [0], [1], [0, 0, 1, 1], [], []>} : vector<16x256xbf16>, vector<256x256xbf16>, vector<16x256xf32> -> vector<16x256xf32>
    %c2 = arith.constant 2 : index
    %c0_14 = arith.constant 0 : index
    %c0_15 = arith.constant 0 : index
    %23 = vector.load %arg1[%c2, %c0_14, %c0_15] : memref<8x16x256xbf16, #tpu.memory_space<vmem>>, vector<1x16x256xbf16>
    %24 = vector.shape_cast %23 : vector<1x16x256xbf16> to vector<16x256xbf16>
    %c3 = arith.constant 3 : index
    %c0_16 = arith.constant 0 : index
    %c0_17 = arith.constant 0 : index
    %25 = vector.load %arg1[%c3, %c0_16, %c0_17] : memref<8x16x256xbf16, #tpu.memory_space<vmem>>, vector<1x16x256xbf16>
    %26 = vector.shape_cast %25 : vector<1x16x256xbf16> to vector<16x256xbf16>
    %cst_18 = arith.constant dense<0.000000e+00> : vector<16x512xf32>
    %27 = tpu.matmul %24, %0, %cst_18 {dimension_numbers = #tpu.dot_dimension_numbers<[1], [0], [0], [1], [0, 0, 1, 1], [], []>} : vector<16x256xbf16>, vector<256x512xbf16>, vector<16x512xf32> -> vector<16x512xf32>
    %cst_19 = arith.constant dense<0.000000e+00> : vector<16x512xf32>
    %28 = tpu.matmul %26, %0, %cst_19 {dimension_numbers = #tpu.dot_dimension_numbers<[1], [0], [0], [1], [0, 0, 1, 1], [], []>} : vector<16x256xbf16>, vector<256x512xbf16>, vector<16x512xf32> -> vector<16x512xf32>
    %29 = vector.extract_strided_slice %27 {offsets = [0, 0], sizes = [16, 256], strides = [1, 1]} : vector<16x512xf32> to vector<16x256xf32>
    %30 = vector.extract_strided_slice %27 {offsets = [0, 256], sizes = [16, 256], strides = [1, 1]} : vector<16x512xf32> to vector<16x256xf32>
    %31 = arith.maximumf %29, %30 : vector<16x256xf32>
    %32 = vector.extract_strided_slice %28 {offsets = [0, 0], sizes = [16, 256], strides = [1, 1]} : vector<16x512xf32> to vector<16x256xf32>
    %33 = vector.extract_strided_slice %28 {offsets = [0, 256], sizes = [16, 256], strides = [1, 1]} : vector<16x512xf32> to vector<16x256xf32>
    %34 = arith.maximumf %32, %33 : vector<16x256xf32>
    %35 = arith.maximumf %31, %34 : vector<16x256xf32>
    %36 = vector.broadcast %1 : vector<1x256xf32> to vector<16x256xf32>
    %37 = arith.addf %35, %36 : vector<16x256xf32>
    %cst_20 = arith.constant 0.000000e+00 : f32
    %38 = vector.broadcast %cst_20 : f32 to vector<16x256xf32>
    %39 = arith.maximumf %37, %38 : vector<16x256xf32>
    %40 = arith.truncf %39 : vector<16x256xf32> to vector<16x256xbf16>
    %c1_21 = arith.constant 1 : index
    %c0_22 = arith.constant 0 : index
    %c0_23 = arith.constant 0 : index
    %41 = vector.load %arg5[%c1_21, %c0_22, %c0_23] : memref<3x256x256xbf16, #tpu.memory_space<vmem>>, vector<1x256x256xbf16>
    %42 = vector.shape_cast %41 : vector<1x256x256xbf16> to vector<256x256xbf16>
    %cst_24 = arith.constant dense<0.000000e+00> : vector<16x256xf32>
    %43 = tpu.matmul %40, %42, %cst_24 {dimension_numbers = #tpu.dot_dimension_numbers<[1], [0], [0], [1], [0, 0, 1, 1], [], []>} : vector<16x256xbf16>, vector<256x256xbf16>, vector<16x256xf32> -> vector<16x256xf32>
    %44 = arith.addf %22, %43 : vector<16x256xf32>
    %c0_25 = arith.constant 0 : index
    %c0_26 = arith.constant 0 : index
    %c0_27 = arith.constant 0 : index
    %45 = vector.load %arg5[%c0_25, %c0_26, %c0_27] : memref<3x256x256xbf16, #tpu.memory_space<vmem>>, vector<1x256x256xbf16>
    %46 = vector.shape_cast %45 : vector<1x256x256xbf16> to vector<256x256xbf16>
    %cst_28 = arith.constant dense<0.000000e+00> : vector<16x256xf32>
    %47 = tpu.matmul %40, %46, %cst_28 {dimension_numbers = #tpu.dot_dimension_numbers<[1], [0], [0], [1], [0, 0, 1, 1], [], []>} : vector<16x256xbf16>, vector<256x256xbf16>, vector<16x256xf32> -> vector<16x256xf32>
    %c4 = arith.constant 4 : index
    %c0_29 = arith.constant 0 : index
    %c0_30 = arith.constant 0 : index
    %48 = vector.load %arg1[%c4, %c0_29, %c0_30] : memref<8x16x256xbf16, #tpu.memory_space<vmem>>, vector<1x16x256xbf16>
    %49 = vector.shape_cast %48 : vector<1x16x256xbf16> to vector<16x256xbf16>
    %c5 = arith.constant 5 : index
    %c0_31 = arith.constant 0 : index
    %c0_32 = arith.constant 0 : index
    %50 = vector.load %arg1[%c5, %c0_31, %c0_32] : memref<8x16x256xbf16, #tpu.memory_space<vmem>>, vector<1x16x256xbf16>
    %51 = vector.shape_cast %50 : vector<1x16x256xbf16> to vector<16x256xbf16>
    %cst_33 = arith.constant dense<0.000000e+00> : vector<16x512xf32>
    %52 = tpu.matmul %49, %0, %cst_33 {dimension_numbers = #tpu.dot_dimension_numbers<[1], [0], [0], [1], [0, 0, 1, 1], [], []>} : vector<16x256xbf16>, vector<256x512xbf16>, vector<16x512xf32> -> vector<16x512xf32>
    %cst_34 = arith.constant dense<0.000000e+00> : vector<16x512xf32>
    %53 = tpu.matmul %51, %0, %cst_34 {dimension_numbers = #tpu.dot_dimension_numbers<[1], [0], [0], [1], [0, 0, 1, 1], [], []>} : vector<16x256xbf16>, vector<256x512xbf16>, vector<16x512xf32> -> vector<16x512xf32>
    %54 = vector.extract_strided_slice %52 {offsets = [0, 0], sizes = [16, 256], strides = [1, 1]} : vector<16x512xf32> to vector<16x256xf32>
    %55 = vector.extract_strided_slice %52 {offsets = [0, 256], sizes = [16, 256], strides = [1, 1]} : vector<16x512xf32> to vector<16x256xf32>
    %56 = arith.maximumf %54, %55 : vector<16x256xf32>
    %57 = vector.extract_strided_slice %53 {offsets = [0, 0], sizes = [16, 256], strides = [1, 1]} : vector<16x512xf32> to vector<16x256xf32>
    %58 = vector.extract_strided_slice %53 {offsets = [0, 256], sizes = [16, 256], strides = [1, 1]} : vector<16x512xf32> to vector<16x256xf32>
    %59 = arith.maximumf %57, %58 : vector<16x256xf32>
    %60 = arith.maximumf %56, %59 : vector<16x256xf32>
    %61 = vector.broadcast %1 : vector<1x256xf32> to vector<16x256xf32>
    %62 = arith.addf %60, %61 : vector<16x256xf32>
    %cst_35 = arith.constant 0.000000e+00 : f32
    %63 = vector.broadcast %cst_35 : f32 to vector<16x256xf32>
    %64 = arith.maximumf %62, %63 : vector<16x256xf32>
    %65 = arith.truncf %64 : vector<16x256xf32> to vector<16x256xbf16>
    %c2_36 = arith.constant 2 : index
    %c0_37 = arith.constant 0 : index
    %c0_38 = arith.constant 0 : index
    %66 = vector.load %arg5[%c2_36, %c0_37, %c0_38] : memref<3x256x256xbf16, #tpu.memory_space<vmem>>, vector<1x256x256xbf16>
    %67 = vector.shape_cast %66 : vector<1x256x256xbf16> to vector<256x256xbf16>
    %cst_39 = arith.constant dense<0.000000e+00> : vector<16x256xf32>
    %68 = tpu.matmul %65, %67, %cst_39 {dimension_numbers = #tpu.dot_dimension_numbers<[1], [0], [0], [1], [0, 0, 1, 1], [], []>} : vector<16x256xbf16>, vector<256x256xbf16>, vector<16x256xf32> -> vector<16x256xf32>
    %69 = arith.addf %44, %68 : vector<16x256xf32>
    %c1_40 = arith.constant 1 : index
    %c0_41 = arith.constant 0 : index
    %c0_42 = arith.constant 0 : index
    %70 = vector.load %arg5[%c1_40, %c0_41, %c0_42] : memref<3x256x256xbf16, #tpu.memory_space<vmem>>, vector<1x256x256xbf16>
    %71 = vector.shape_cast %70 : vector<1x256x256xbf16> to vector<256x256xbf16>
    %cst_43 = arith.constant dense<0.000000e+00> : vector<16x256xf32>
    %72 = tpu.matmul %65, %71, %cst_43 {dimension_numbers = #tpu.dot_dimension_numbers<[1], [0], [0], [1], [0, 0, 1, 1], [], []>} : vector<16x256xbf16>, vector<256x256xbf16>, vector<16x256xf32> -> vector<16x256xf32>
    %73 = arith.addf %47, %72 : vector<16x256xf32>
    %c6 = arith.constant 6 : index
    %c0_44 = arith.constant 0 : index
    %c0_45 = arith.constant 0 : index
    %74 = vector.load %arg1[%c6, %c0_44, %c0_45] : memref<8x16x256xbf16, #tpu.memory_space<vmem>>, vector<1x16x256xbf16>
    %75 = vector.shape_cast %74 : vector<1x16x256xbf16> to vector<16x256xbf16>
    %c7 = arith.constant 7 : index
    %c0_46 = arith.constant 0 : index
    %c0_47 = arith.constant 0 : index
    %76 = vector.load %arg1[%c7, %c0_46, %c0_47] : memref<8x16x256xbf16, #tpu.memory_space<vmem>>, vector<1x16x256xbf16>
    %77 = vector.shape_cast %76 : vector<1x16x256xbf16> to vector<16x256xbf16>
    %cst_48 = arith.constant dense<0.000000e+00> : vector<16x512xf32>
    %78 = tpu.matmul %75, %0, %cst_48 {dimension_numbers = #tpu.dot_dimension_numbers<[1], [0], [0], [1], [0, 0, 1, 1], [], []>} : vector<16x256xbf16>, vector<256x512xbf16>, vector<16x512xf32> -> vector<16x512xf32>
    %cst_49 = arith.constant dense<0.000000e+00> : vector<16x512xf32>
    %79 = tpu.matmul %77, %0, %cst_49 {dimension_numbers = #tpu.dot_dimension_numbers<[1], [0], [0], [1], [0, 0, 1, 1], [], []>} : vector<16x256xbf16>, vector<256x512xbf16>, vector<16x512xf32> -> vector<16x512xf32>
    %80 = vector.extract_strided_slice %78 {offsets = [0, 0], sizes = [16, 256], strides = [1, 1]} : vector<16x512xf32> to vector<16x256xf32>
    %81 = vector.extract_strided_slice %78 {offsets = [0, 256], sizes = [16, 256], strides = [1, 1]} : vector<16x512xf32> to vector<16x256xf32>
    %82 = arith.maximumf %80, %81 : vector<16x256xf32>
    %83 = vector.extract_strided_slice %79 {offsets = [0, 0], sizes = [16, 256], strides = [1, 1]} : vector<16x512xf32> to vector<16x256xf32>
    %84 = vector.extract_strided_slice %79 {offsets = [0, 256], sizes = [16, 256], strides = [1, 1]} : vector<16x512xf32> to vector<16x256xf32>
    %85 = arith.maximumf %83, %84 : vector<16x256xf32>
    %86 = arith.maximumf %82, %85 : vector<16x256xf32>
    %87 = vector.broadcast %1 : vector<1x256xf32> to vector<16x256xf32>
    %88 = arith.addf %86, %87 : vector<16x256xf32>
    %cst_50 = arith.constant 0.000000e+00 : f32
    %89 = vector.broadcast %cst_50 : f32 to vector<16x256xf32>
    %90 = arith.maximumf %88, %89 : vector<16x256xf32>
    %91 = arith.truncf %90 : vector<16x256xf32> to vector<16x256xbf16>
    %c2_51 = arith.constant 2 : index
    %c0_52 = arith.constant 0 : index
    %c0_53 = arith.constant 0 : index
    %92 = vector.load %arg5[%c2_51, %c0_52, %c0_53] : memref<3x256x256xbf16, #tpu.memory_space<vmem>>, vector<1x256x256xbf16>
    %93 = vector.shape_cast %92 : vector<1x256x256xbf16> to vector<256x256xbf16>
    %cst_54 = arith.constant dense<0.000000e+00> : vector<16x256xf32>
    %94 = tpu.matmul %91, %93, %cst_54 {dimension_numbers = #tpu.dot_dimension_numbers<[1], [0], [0], [1], [0, 0, 1, 1], [], []>} : vector<16x256xbf16>, vector<256x256xbf16>, vector<16x256xf32> -> vector<16x256xf32>
    %95 = arith.addf %73, %94 : vector<16x256xf32>
    %96 = vector.extract_strided_slice %69 {offsets = [0, 0], sizes = [16, 128], strides = [1, 1]} : vector<16x256xf32> to vector<16x128xf32>
    %97 = vector.extract_strided_slice %69 {offsets = [0, 128], sizes = [16, 128], strides = [1, 1]} : vector<16x256xf32> to vector<16x128xf32>
    %98 = arith.maximumf %96, %97 : vector<16x128xf32>
    %99 = vector.extract_strided_slice %95 {offsets = [0, 0], sizes = [16, 128], strides = [1, 1]} : vector<16x256xf32> to vector<16x128xf32>
    %100 = vector.extract_strided_slice %95 {offsets = [0, 128], sizes = [16, 128], strides = [1, 1]} : vector<16x256xf32> to vector<16x128xf32>
    %101 = arith.maximumf %99, %100 : vector<16x128xf32>
    %102 = arith.maximumf %98, %101 : vector<16x128xf32>
    %c0_55 = arith.constant 0 : index
    %c0_56 = arith.constant 0 : index
    %103 = vector.load %arg6[%c0_55, %c0_56] : memref<1x128xf32, #tpu.memory_space<vmem>>, vector<1x128xf32>
    %104 = vector.broadcast %103 : vector<1x128xf32> to vector<16x128xf32>
    %105 = arith.addf %102, %104 : vector<16x128xf32>
    %cst_57 = arith.constant 0.000000e+00 : f32
    %106 = vector.broadcast %cst_57 : f32 to vector<16x128xf32>
    %107 = arith.maximumf %105, %106 : vector<16x128xf32>
    %108 = arith.truncf %107 : vector<16x128xf32> to vector<16x128xbf16>
    %c0_58 = arith.constant 0 : index
    %c0_59 = arith.constant 0 : index
    %109 = vector.load %arg7[%c0_58, %c0_59] : memref<128x64xbf16, #tpu.memory_space<vmem>>, vector<128x64xbf16>
    %cst_60 = arith.constant dense<0.000000e+00> : vector<16x64xf32>
    %110 = tpu.matmul %108, %109, %cst_60 {dimension_numbers = #tpu.dot_dimension_numbers<[1], [0], [0], [1], [0, 0, 1, 1], [], []>} : vector<16x128xbf16>, vector<128x64xbf16>, vector<16x64xf32> -> vector<16x64xf32>
    %c0_61 = arith.constant 0 : index
    %c0_62 = arith.constant 0 : index
    %111 = vector.load %arg2[%c0_61, %c0_62] : memref<16x41xbf16, #tpu.memory_space<vmem>>, vector<16x41xbf16>
    %c0_63 = arith.constant 0 : index
    %c0_64 = arith.constant 0 : index
    %112 = vector.load %arg8[%c0_63, %c0_64] : memref<41x64xbf16, #tpu.memory_space<vmem>>, vector<41x64xbf16>
    %cst_65 = arith.constant dense<0.000000e+00> : vector<16x64xf32>
    %113 = tpu.matmul %111, %112, %cst_65 {dimension_numbers = #tpu.dot_dimension_numbers<[1], [0], [0], [1], [0, 0, 1, 1], [], []>} : vector<16x41xbf16>, vector<41x64xbf16>, vector<16x64xf32> -> vector<16x64xf32>
    %114 = arith.addf %110, %113 : vector<16x64xf32>
    %c0_66 = arith.constant 0 : index
    %c0_67 = arith.constant 0 : index
    %115 = vector.load %arg9[%c0_66, %c0_67] : memref<1x64xf32, #tpu.memory_space<vmem>>, vector<1x64xf32>
    %116 = vector.broadcast %115 : vector<1x64xf32> to vector<16x64xf32>
    %117 = arith.addf %114, %116 : vector<16x64xf32>
    %cst_68 = arith.constant 0.000000e+00 : f32
    %118 = vector.broadcast %cst_68 : f32 to vector<16x64xf32>
    %119 = arith.maximumf %117, %118 : vector<16x64xf32>
    %c0_69 = arith.constant 0 : index
    %c0_70 = arith.constant 0 : index
    %120 = vector.load %arg10[%c0_69, %c0_70] : memref<1x64xf32, #tpu.memory_space<vmem>>, vector<1x64xf32>
    %121 = vector.broadcast %120 : vector<1x64xf32> to vector<16x64xf32>
    %122 = arith.mulf %119, %121 : vector<16x64xf32>
    %cst_71 = arith.constant dense<0.000000e+00> : vector<16xf32>
    %123 = vector.multi_reduction <add>, %122, %cst_71 [1] : vector<16x64xf32> to vector<16xf32>
    %124 = vector.shape_cast %123 : vector<16xf32> to vector<16x1xf32>
    %c0_72 = arith.constant 0 : index
    %c0_73 = arith.constant 0 : index
    %125 = vector.load %arg11[%c0_72, %c0_73] : memref<1x1xf32, #tpu.memory_space<vmem>>, vector<1x1xf32>
    %126 = vector.broadcast %125 : vector<1x1xf32> to vector<16x1xf32>
    %127 = arith.addf %124, %126 : vector<16x1xf32>
    %c0_74 = arith.constant 0 : index
    %c0_75 = arith.constant 0 : index
    %128 = vector.load %arg12[%c0_74, %c0_75] : memref<16x1xf32, #tpu.memory_space<vmem>>, vector<16x1xf32>
    tpu.vector_store %arg12[%c0_74, %c0_75], %127 {strides = array<i32>} : memref<16x1xf32, #tpu.memory_space<vmem>>, vector<16x1xf32>,
    return
  }
  func.func @transform_0(%arg0: i32) -> (i32, i32, i32) {
    %c0_i32 = arith.constant 0 : i32
    %c0_i32_0 = arith.constant 0 : i32
    %c0_i32_1 = arith.constant 0 : i32
    return %c0_i32, %arg0, %c0_i32_0 : i32, i32, i32
  }
  func.func @transform_1(%arg0: i32) -> (i32, i32) {
    %c0_i32 = arith.constant 0 : i32
    %c0_i32_0 = arith.constant 0 : i32
    return %arg0, %c0_i32 : i32, i32
  }
  func.func @transform_2(%arg0: i32) -> (i32, i32) {
    %c0_i32 = arith.constant 0 : i32
    %c0_i32_0 = arith.constant 0 : i32
    %c0_i32_1 = arith.constant 0 : i32
    return %c0_i32, %c0_i32_0 : i32, i32
  }
  func.func @transform_3(%arg0: i32) -> (i32, i32) {
    %c0_i32 = arith.constant 0 : i32
    %c0_i32_0 = arith.constant 0 : i32
    %c0_i32_1 = arith.constant 0 : i32
    return %c0_i32, %c0_i32_0 : i32, i32
  }
  func.func @transform_4(%arg0: i32) -> (i32, i32, i32) {
    %c0_i32 = arith.constant 0 : i32
    %c0_i32_0 = arith.constant 0 : i32
    %c0_i32_1 = arith.constant 0 : i32
    %c0_i32_2 = arith.constant 0 : i32
    return %c0_i32, %c0_i32_0, %c0_i32_1 : i32, i32, i32
  }
  func.func @transform_5(%arg0: i32) -> (i32, i32) {
    %c0_i32 = arith.constant 0 : i32
    %c0_i32_0 = arith.constant 0 : i32
    %c0_i32_1 = arith.constant 0 : i32
    return %c0_i32, %c0_i32_0 : i32, i32
  }
  func.func @transform_6(%arg0: i32) -> (i32, i32) {
    %c0_i32 = arith.constant 0 : i32
    %c0_i32_0 = arith.constant 0 : i32
    %c0_i32_1 = arith.constant 0 : i32
    return %c0_i32, %c0_i32_0 : i32, i32
  }
  func.func @transform_7(%arg0: i32) -> (i32, i32) {
    %c0_i32 = arith.constant 0 : i32
    %c0_i32_0 = arith.constant 0 : i32
    %c0_i32_1 = arith.constant 0 : i32
    return %c0_i32, %c0_i32_0 : i32, i32
  }
  func.func @transform_8(%arg0: i32) -> (i32, i32) {
    %c0_i32 = arith.constant 0 : i32
    %c0_i32_0 = arith.constant 0 : i32
    %c0_i32_1 = arith.constant 0 : i32
    return %c0_i32, %c0_i32_0 : i32, i32
  }
  func.func @transform_9(%arg0: i32) -> (i32, i32) {
    %c0_i32 = arith.constant 0 : i32
    %c0_i32_0 = arith.constant 0 : i32
    %c0_i32_1 = arith.constant 0 : i32
    return %c0_i32, %c0_i32_0 : i32, i32
  }
  func.func @transform_10(%arg0: i32) -> (i32, i32) {
    %c0_i32 = arith.constant 0 : i32
    %c0_i32_0 = arith.constant 0 : i32
    %c0_i32_1 = arith.constant 0 : i32
    return %c0_i32, %c0_i32_0 : i32, i32
  }
  func.func @transform_11(%arg0: i32) -> (i32, i32) {
    %c0_i32 = arith.constant 0 : i32
    %c0_i32_0 = arith.constant 0 : i32
    return %arg0, %c0_i32 : i32, i32
  }
}

</mosaic_0001>

<bundles_post_ra>
// kernel: critic_forward.1
= control target key start
LH: loop header
LB: loop body
LE: loop exit
PB: predicated region body
PF: predicated region fallthrough
CT: control target
= control target key end

     0   :  { %vm2228_vm0 = vcmask 1043456   ;;  %vm2229_vm1 = vcmask 1044480   ;;  %vm3098_vm2 = vmmov 0   ;;  %vm2224_vm3 = vcmask 334848   ;;  %s5287_s2 = inlined_call_operand.vmem [shape: bf16[256,512], index: 2, kind: input, shape index: {}]   ;;  %s5288_s0 = inlined_call_operand.vmem [shape: bf16[8,16,256], index: 0, kind: input, shape index: {}]   ;;  %s5289_s4 = inlined_call_operand.vmem [shape: bf16[3,256,256], index: 4, kind: input, shape index: {}]   ;;  %s5290_s3 = inlined_call_operand.vmem [shape: f32[1,256], index: 3, kind: input, shape index: {}]   ;;  %s5291_s6 = inlined_call_operand.vmem [shape: bf16[128,64], index: 6, kind: input, shape index: {}]   ;;  %s5292_s7 = inlined_call_operand.vmem [shape: bf16[41,64], index: 7, kind: input, shape index: {}]   ;;  %s5293_s1 = inlined_call_operand.vmem [shape: bf16[16,41], index: 1, kind: input, shape index: {}]   ;;  %s5294_s5 = inlined_call_operand.vmem [shape: f32[1,128], index: 5, kind: input, shape index: {}]   ;;  %s5295_s10 = inlined_call_operand.<no memory space> [shape: f32[1,1], index: 10, kind: input, shape index: {}]   ;;  %s5296_s8 = inlined_call_operand.vmem [shape: f32[1,64], index: 8, kind: input, shape index: {}]   ;;  %s5297_s9 = inlined_call_operand.vmem [shape: f32[1,64], index: 9, kind: input, shape index: {}]   ;;  %s5298_s11 = inlined_call_operand.vmem [shape: f32[16,1], index: 11, kind: output, shape index: {}]  }
   0x1   :  { %v3162_v0 = vld [vmem:[%s5287_s2 + $0x4] ss:$16 sps:$4 sm:$0xff]   ;;  %v3167_v1 = vld [vmem:[%s5287_s2 + $0xc] ss:$16 sps:$4 sm:$0xff]   ;;  %v3173_v2 = vld [vmem:[%s5287_s2] ss:$16 sps:$4 sm:$0xff]  }
   0x2   :  { %441 = vmatprep.subr.bf16.mxu0 %v3162_v0  ;;  %v3178_v3 = vld [vmem:[%s5287_s2 + $0x8] ss:$16 sps:$4 sm:$0xff]   ;;  %484 = vmatprep.subr.bf16.mxu1 %v3167_v1  ;;  %v3184_v4 = vld [vmem:[%s5287_s2 + $0x24] ss:$16 sps:$4 sm:$0xff]   ;;  %v3191_v5 = vld [vmem:[%s5287_s2 + $0x2c] ss:$16 sps:$4 sm:$0xff]  }
   0x3   :  { %442 = vmatpush1.bf16.msra.mxu0 %v3173_v2  ;;  %485 = vmatpush1.bf16.msra.mxu1 %v3178_v3  ;;  %v3196_v6 = vld [vmem:[%s5287_s2 + $0x20] ss:$16 sps:$4 sm:$0xff]   ;;  %v3202_v7 = vld [vmem:[%s5287_s2 + $0x28] ss:$16 sps:$4 sm:$0xff]   ;;  %v3208_v8 = vld [vmem:[%s5287_s2 + $0x44] ss:$16 sps:$4 sm:$0xff]  }
   0x4   :  { %443 = vmatprep.subr.bf16.mxu0 %v3184_v4  ;;  %486 = vmatprep.subr.bf16.mxu1 %v3191_v5  ;;  %v3213_v9 = vld [vmem:[%s5287_s2 + $0x4c] ss:$16 sps:$4 sm:$0xff]   ;;  %v3218_v10 = vld [vmem:[%s5287_s2 + $0x40] ss:$16 sps:$4 sm:$0xff]   ;;  %v3223_v11 = vld [vmem:[%s5287_s2 + $0x48] ss:$16 sps:$4 sm:$0xff]  }
   0x5   :  { %v3230_v12 = vld [vmem:[%s5287_s2 + $0x64] ss:$16 sps:$4 sm:$0xff]   ;;  %v3237_v13 = vld [vmem:[%s5287_s2 + $0x6c] ss:$16 sps:$4 sm:$0xff]   ;;  %v3242_v14 = vld [vmem:[%s5287_s2 + $0x60] ss:$16 sps:$4 sm:$0xff]  }
   0x6   :  { %v3249_v15 = vld [vmem:[%s5287_s2 + $0x68] ss:$16 sps:$4 sm:$0xff]   ;;  %v3254_v16 = vld [vmem:[%s5287_s2 + $0x84] ss:$16 sps:$4 sm:$0xff]   ;;  %v3261_v17 = vld [vmem:[%s5287_s2 + $0x8c] ss:$16 sps:$4 sm:$0xff]  }
   0x7   :  { %444 = vmatpush1.bf16.msra.mxu0 %v3196_v6  ;;  %487 = vmatpush1.bf16.msra.mxu1 %v3202_v7  ;;  %v3266_v18 = vld [vmem:[%s5287_s2 + $0x80] ss:$16 sps:$4 sm:$0xff]   ;;  %v3271_v19 = vld [vmem:[%s5287_s2 + $0x88] ss:$16 sps:$4 sm:$0xff]   ;;  %v3278_v20 = vld [vmem:[%s5287_s2 + $0xa4] ss:$16 sps:$4 sm:$0xff]  }
   0x8   :  { %445 = vmatprep.subr.bf16.mxu0 %v3208_v8  ;;  %488 = vmatprep.subr.bf16.mxu1 %v3213_v9  ;;  %v3285_v21 = vld [vmem:[%s5287_s2 + $0xac] ss:$16 sps:$4 sm:$0xff]   ;;  %v3290_v22 = vld [vmem:[%s5287_s2 + $0xa0] ss:$16 sps:$4 sm:$0xff]   ;;  %v3297_v23 = vld [vmem:[%s5287_s2 + $0xa8] ss:$16 sps:$4 sm:$0xff]  }
   0x9   :  { %v3302_v24 = vld [vmem:[%s5287_s2 + $0xc4] ss:$16 sps:$4 sm:$0xff]   ;;  %v3309_v25 = vld [vmem:[%s5287_s2 + $0xcc] ss:$16 sps:$4 sm:$0xff]   ;;  %v3314_v26 = vld [vmem:[%s5287_s2 + $0xc0] ss:$16 sps:$4 sm:$0xff]  }
   0xa   :  { %v3319_v27 = vld [vmem:[%s5287_s2 + $0xc8] ss:$16 sps:$4 sm:$0xff]   ;;  %v3326_v28 = vld [vmem:[%s5287_s2 + $0xe4] ss:$16 sps:$4 sm:$0xff]   ;;  %v3333_v29 = vld [vmem:[%s5287_s2 + $0xec] ss:$16 sps:$4 sm:$0xff]  }
   0xb   :  { %446 = vmatpush1.bf16.msra.mxu0 %v3218_v10  ;;  %489 = vmatpush1.bf16.msra.mxu1 %v3223_v11  ;;  %v3338_v30 = vld [vmem:[%s5287_s2 + $0xe0] ss:$16 sps:$4 sm:$0xff]   ;;  %v3345_v31 = vld [vmem:[%s5287_s2 + $0xe8] ss:$16 sps:$4 sm:$0xff]   ;;  %v3350_v32 = vld [vmem:[%s5287_s2 + $0x104] ss:$16 sps:$4 sm:$0xff]  }
   0xc   :  { %447 = vmatprep.subr.bf16.mxu0 %v3230_v12  ;;  %490 = vmatprep.subr.bf16.mxu1 %v3237_v13  ;;  %v3357_v33 = vld [vmem:[%s5287_s2 + $0x10c] ss:$16 sps:$4 sm:$0xff]   ;;  %v3362_v34 = vld [vmem:[%s5287_s2 + $0x100] ss:$16 sps:$4 sm:$0xff]   ;;  %v3367_v35 = vld [vmem:[%s5287_s2 + $0x108] ss:$16 sps:$4 sm:$0xff]  }
   0xd   :  { %v3374_v36 = vld [vmem:[%s5287_s2 + $0x124] ss:$16 sps:$4 sm:$0xff]   ;;  %v3381_v37 = vld [vmem:[%s5287_s2 + $0x12c] ss:$16 sps:$4 sm:$0xff]   ;;  %v3386_v38 = vld [vmem:[%s5287_s2 + $0x120] ss:$16 sps:$4 sm:$0xff]  }
   0xe   :  { %v3393_v39 = vld [vmem:[%s5287_s2 + $0x128] ss:$16 sps:$4 sm:$0xff]   ;;  %v3398_v40 = vld [vmem:[%s5287_s2 + $0x144] ss:$16 sps:$4 sm:$0xff]   ;;  %v3405_v41 = vld [vmem:[%s5287_s2 + $0x14c] ss:$16 sps:$4 sm:$0xff]  }
   0xf   :  { %448 = vmatpush1.bf16.msra.mxu0 %v3242_v14  ;;  %491 = vmatpush1.bf16.msra.mxu1 %v3249_v15  ;;  %v3410_v42 = vld [vmem:[%s5287_s2 + $0x140] ss:$16 sps:$4 sm:$0xff]   ;;  %v3415_v43 = vld [vmem:[%s5287_s2 + $0x148] ss:$16 sps:$4 sm:$0xff]   ;;  %v3422_v44 = vld [vmem:[%s5287_s2 + $0x164] ss:$16 sps:$4 sm:$0xff]  }
  0x10   :  { %449 = vmatprep.subr.bf16.mxu0 %v3254_v16  ;;  %492 = vmatprep.subr.bf16.mxu1 %v3261_v17  ;;  %v3429_v45 = vld [vmem:[%s5287_s2 + $0x16c] ss:$16 sps:$4 sm:$0xff]   ;;  %v3434_v46 = vld [vmem:[%s5287_s2 + $0x160] ss:$16 sps:$4 sm:$0xff]   ;;  %v3439_v47 = vld [vmem:[%s5287_s2 + $0x168] ss:$16 sps:$4 sm:$0xff]  }
  0x11   :  { %v2839_v48 = vld [vmem:[%s5288_s0 + $0x4] ss:$8 sps:$4 sm:$0xff]   ;;  %v3461_v51 = vld [vmem:[%s5287_s2 + $0x180] ss:$16 sps:$4 sm:$0xff]   ;;  %v3466_v52 = vld [vmem:[%s5287_s2 + $0x188] ss:$16 sps:$4 sm:$0xff]  }
  0x12   :  { %v3449_v49 = vld [vmem:[%s5287_s2 + $0x184] ss:$16 sps:$4 sm:$0xff]   ;;  %v3456_v50 = vld [vmem:[%s5287_s2 + $0x18c] ss:$16 sps:$4 sm:$0xff]   ;;  %473 = vmatprep.mubr.bf16.mxu0 %v2839_v48  ;;  %516 = vmatprep.mubr.bf16.mxu1 %v2839_v48  ;;  %v3487_v55 = vld [vmem:[%s5287_s2 + $0x1a0] ss:$16 sps:$4 sm:$0xff]  }
  0x13   :  { %450 = vmatpush1.bf16.msra.mxu0 %v3266_v18  ;;  %493 = vmatpush1.bf16.msra.mxu1 %v3271_v19  ;;  %v3475_v53 = vld [vmem:[%s5287_s2 + $0x1a4] ss:$16 sps:$4 sm:$0xff]   ;;  %v3480_v54 = vld [vmem:[%s5287_s2 + $0x1ac] ss:$16 sps:$4 sm:$0xff]   ;;  %v3492_v56 = vld [vmem:[%s5287_s2 + $0x1a8] ss:$16 sps:$4 sm:$0xff]  }
  0x14   :  { %451 = vmatprep.subr.bf16.mxu0 %v3278_v20  ;;  %494 = vmatprep.subr.bf16.mxu1 %v3285_v21  ;;  %5435 = vst [vmem:[#allocation3_spill] sm:$0xff] %v3480_v54  ;;  %v3499_v57 = vld [vmem:[%s5287_s2 + $0x1c4] ss:$16 sps:$4 sm:$0xff]   ;;  %v3504_v58 = vld [vmem:[%s5287_s2 + $0x1cc] ss:$16 sps:$4 sm:$0xff]   ;;  %vm2385_vm4 = vcmask 523264  }
  0x15   :  { %v3511_v59 = vld [vmem:[%s5287_s2 + $0x1c0] ss:$16 sps:$4 sm:$0xff]   ;;  %v3516_v60 = vld [vmem:[%s5287_s2 + $0x1c8] ss:$16 sps:$4 sm:$0xff]   ;;  %v3523_v61 = vld [vmem:[%s5287_s2 + $0x1e4] ss:$16 sps:$4 sm:$0xff]  }
  0x16   :  { %5436 = vst [vmem:[#allocation4_spill] sm:$0xff] %v3511_v59  ;;  %5437 = vst [vmem:[#allocation5_spill] sm:$0xff] %v3516_v60  ;;  %v3528_v62 = vld [vmem:[%s5287_s2 + $0x1ec] ss:$16 sps:$4 sm:$0xff]   ;;  %v3535_v63 = vld [vmem:[%s5287_s2 + $0x1e0] ss:$16 sps:$4 sm:$0xff]  }
  0x17   :  { %452 = vmatpush1.bf16.msra.mxu0 %v3290_v22  ;;  %495 = vmatpush1.bf16.msra.mxu1 %v3297_v23  ;;  %v3540_v48 = vld [vmem:[%s5287_s2 + $0x1e8] ss:$16 sps:$4 sm:$0xff]   ;;  %vm2401_vm5 = vcmask 7168  }
  0x18   :  { %453 = vmatprep.subr.bf16.mxu0 %v3302_v24  ;;  %496 = vmatprep.subr.bf16.mxu1 %v3309_v25 }
  0x1b   :  { %454 = vmatpush1.bf16.msra.mxu0 %v3314_v26  ;;  %497 = vmatpush1.bf16.msra.mxu1 %v3319_v27 }
  0x1c   :  { %455 = vmatprep.subr.bf16.mxu0 %v3326_v28  ;;  %498 = vmatprep.subr.bf16.mxu1 %v3333_v29 }
  0x1f   :  { %456 = vmatpush1.bf16.msra.mxu0 %v3338_v30  ;;  %499 = vmatpush1.bf16.msra.mxu1 %v3345_v31 }
  0x20   :  { %457 = vmatprep.subr.bf16.mxu0 %v3350_v32  ;;  %500 = vmatprep.subr.bf16.mxu1 %v3357_v33 }
  0x23   :  { %458 = vmatpush1.bf16.msra.mxu0 %v3362_v34  ;;  %501 = vmatpush1.bf16.msra.mxu1 %v3367_v35 }
  0x24   :  { %459 = vmatprep.subr.bf16.mxu0 %v3374_v36  ;;  %502 = vmatprep.subr.bf16.mxu1 %v3381_v37 }
  0x27   :  { %460 = vmatpush1.bf16.msra.mxu0 %v3386_v38  ;;  %503 = vmatpush1.bf16.msra.mxu1 %v3393_v39 }
  0x28   :  { %461 = vmatprep.subr.bf16.mxu0 %v3398_v40  ;;  %504 = vmatprep.subr.bf16.mxu1 %v3405_v41 }
  0x2b   :  { %462 = vmatpush1.bf16.msra.mxu0 %v3410_v42  ;;  %505 = vmatpush1.bf16.msra.mxu1 %v3415_v43 }
  0x2c   :  { %463 = vmatprep.subr.bf16.mxu0 %v3422_v44  ;;  %506 = vmatprep.subr.bf16.mxu1 %v3429_v45 }
  0x2f   :  { %464 = vmatpush1.bf16.msra.mxu0 %v3434_v46  ;;  %507 = vmatpush1.bf16.msra.mxu1 %v3439_v47 }
  0x30   :  { %465 = vmatprep.subr.bf16.mxu0 %v3449_v49  ;;  %508 = vmatprep.subr.bf16.mxu1 %v3456_v50 }
  0x33   :  { %466 = vmatpush1.bf16.msra.mxu0 %v3461_v51  ;;  %509 = vmatpush1.bf16.msra.mxu1 %v3466_v52 }
  0x34   :  { %467 = vmatprep.subr.bf16.mxu0 %v3475_v53  ;;  %510 = vmatprep.subr.bf16.mxu1 %v3480_v54 }
  0x37   :  { %468 = vmatpush1.bf16.msra.mxu0 %v3487_v55  ;;  %511 = vmatpush1.bf16.msra.mxu1 %v3492_v56 }
  0x38   :  { %469 = vmatprep.subr.bf16.mxu0 %v3499_v57  ;;  %512 = vmatprep.subr.bf16.mxu1 %v3504_v58 }
  0x3b   :  { %470 = vmatpush1.bf16.msra.mxu0 %v3511_v59  ;;  %513 = vmatpush1.bf16.msra.mxu1 %v3516_v60  ;;  %v2837_v59 = vld [vmem:[%s5288_s0] ss:$8 sps:$4 sm:$0xff]   ;;  %v2842_v60 = vld [vmem:[%s5288_s0 + $0x14] ss:$8 sps:$4 sm:$0xff]  }
  0x3c   :  { %471 = vmatprep.subr.bf16.mxu0 %v3523_v61  ;;  %514 = vmatprep.subr.bf16.mxu1 %v3528_v62 }
  0x3f   :  { %472 = vmatpush1.bf16.msra.mxu0 %v3535_v63  ;;  %515 = vmatpush1.bf16.msra.mxu1 %v3540_v48 }
  0x40   :  { %537 = vmatprep.subr.bf16.mxu0 %v3162_v0  ;;  %580 = vmatprep.subr.bf16.mxu1 %v3167_v1 }
  0x42   :  { %474 = vmatmul.mubr.bf16.vlgmr.msra.gmra.mrb[0].mxu0 %v2837_v59  ;;  %517 = vmatmul.mubr.bf16.vlgmr.msra.gmra.mrb[0].mxu1 %v2837_v59  ;;  %v5438_v59 = vld [vmem:[#allocation4_spill] sm:$0xff] }
  0x43   :  { %538 = vmatpush1.bf16.msra.mxu0 %v3173_v2  ;;  %581 = vmatpush1.bf16.msra.mxu1 %v3178_v3 }
  0x44   :  { %539 = vmatprep.subr.bf16.mxu0 %v3184_v4  ;;  %582 = vmatprep.subr.bf16.mxu1 %v3191_v5 }
  0x45   :  { %569 = vmatprep.mubr.bf16.mxu0 %v2842_v60  ;;  %612 = vmatprep.mubr.bf16.mxu1 %v2842_v60  ;;  %v5439_v60 = vld [vmem:[#allocation5_spill] sm:$0xff] }
  0x47   :  { %540 = vmatpush1.bf16.msra.mxu0 %v3196_v6  ;;  %583 = vmatpush1.bf16.msra.mxu1 %v3202_v7 }
  0x48   :  { %541 = vmatprep.subr.bf16.mxu0 %v3208_v8  ;;  %584 = vmatprep.subr.bf16.mxu1 %v3213_v9 }
  0x4b   :  { %542 = vmatpush1.bf16.msra.mxu0 %v3218_v10  ;;  %585 = vmatpush1.bf16.msra.mxu1 %v3223_v11 }
  0x4c   :  { %543 = vmatprep.subr.bf16.mxu0 %v3230_v12  ;;  %586 = vmatprep.subr.bf16.mxu1 %v3237_v13 }
  0x4f   :  { %544 = vmatpush1.bf16.msra.mxu0 %v3242_v14  ;;  %587 = vmatpush1.bf16.msra.mxu1 %v3249_v15 }
  0x50   :  { %545 = vmatprep.subr.bf16.mxu0 %v3254_v16  ;;  %588 = vmatprep.subr.bf16.mxu1 %v3261_v17 }
  0x53   :  { %546 = vmatpush1.bf16.msra.mxu0 %v3266_v18  ;;  %589 = vmatpush1.bf16.msra.mxu1 %v3271_v19 }
  0x54   :  { %547 = vmatprep.subr.bf16.mxu0 %v3278_v20  ;;  %590 = vmatprep.subr.bf16.mxu1 %v3285_v21 }
  0x57   :  { %548 = vmatpush1.bf16.msra.mxu0 %v3290_v22  ;;  %591 = vmatpush1.bf16.msra.mxu1 %v3297_v23 }
  0x58   :  { %549 = vmatprep.subr.bf16.mxu0 %v3302_v24  ;;  %592 = vmatprep.subr.bf16.mxu1 %v3309_v25 }
  0x5b   :  { %550 = vmatpush1.bf16.msra.mxu0 %v3314_v26  ;;  %593 = vmatpush1.bf16.msra.mxu1 %v3319_v27 }
  0x5c   :  { %551 = vmatprep.subr.bf16.mxu0 %v3326_v28  ;;  %594 = vmatprep.subr.bf16.mxu1 %v3333_v29 }
  0x5f   :  { %552 = vmatpush1.bf16.msra.mxu0 %v3338_v30  ;;  %595 = vmatpush1.bf16.msra.mxu1 %v3345_v31 }
  0x60   :  { %553 = vmatprep.subr.bf16.mxu0 %v3350_v32  ;;  %596 = vmatprep.subr.bf16.mxu1 %v3357_v33 }
  0x63   :  { %554 = vmatpush1.bf16.msra.mxu0 %v3362_v34  ;;  %597 = vmatpush1.bf16.msra.mxu1 %v3367_v35 }
  0x64   :  { %555 = vmatprep.subr.bf16.mxu0 %v3374_v36  ;;  %598 = vmatprep.subr.bf16.mxu1 %v3381_v37 }
  0x67   :  { %556 = vmatpush1.bf16.msra.mxu0 %v3386_v38  ;;  %599 = vmatpush1.bf16.msra.mxu1 %v3393_v39 }
  0x68   :  { %557 = vmatprep.subr.bf16.mxu0 %v3398_v40  ;;  %600 = vmatprep.subr.bf16.mxu1 %v3405_v41 }
  0x6b   :  { %558 = vmatpush1.bf16.msra.mxu0 %v3410_v42  ;;  %601 = vmatpush1.bf16.msra.mxu1 %v3415_v43 }
  0x6c   :  { %559 = vmatprep.subr.bf16.mxu0 %v3422_v44  ;;  %602 = vmatprep.subr.bf16.mxu1 %v3429_v45 }
  0x6f   :  { %560 = vmatpush1.bf16.msra.mxu0 %v3434_v46  ;;  %603 = vmatpush1.bf16.msra.mxu1 %v3439_v47 }
  0x70   :  { %561 = vmatprep.subr.bf16.mxu0 %v3449_v49  ;;  %604 = vmatprep.subr.bf16.mxu1 %v3456_v50 }
  0x73   :  { %562 = vmatpush1.bf16.msra.mxu0 %v3461_v51  ;;  %605 = vmatpush1.bf16.msra.mxu1 %v3466_v52 }
  0x74   :  { %563 = vmatprep.subr.bf16.mxu0 %v3475_v53  ;;  %606 = vmatprep.subr.bf16.mxu1 %v3480_v54  ;;  %v2840_v54 = vld [vmem:[%s5288_s0 + $0x10] ss:$8 sps:$4 sm:$0xff]  }
  0x77   :  { %564 = vmatpush1.bf16.msra.mxu0 %v3487_v55  ;;  %607 = vmatpush1.bf16.msra.mxu1 %v3492_v56 }
  0x78   :  { %565 = vmatprep.subr.bf16.mxu0 %v3499_v57  ;;  %608 = vmatprep.subr.bf16.mxu1 %v3504_v58 }
  0x7b   :  { %566 = vmatpush1.bf16.msra.mxu0 %v5438_v59  ;;  %609 = vmatpush1.bf16.msra.mxu1 %v5439_v60  ;;  %v2845_v60 = vld [vmem:[%s5288_s0 + $0x24] ss:$8 sps:$4 sm:$0xff]  }
  0x7c   :  { %567 = vmatprep.subr.bf16.mxu0 %v3523_v61  ;;  %610 = vmatprep.subr.bf16.mxu1 %v3528_v62 }
  0x7f   :  { %568 = vmatpush1.bf16.msra.mxu0 %v3535_v63  ;;  %611 = vmatpush1.bf16.msra.mxu1 %v3540_v48 }
  0x80   :  { %704 = vmatprep.subr.bf16.mxu0 %v3162_v0  ;;  %747 = vmatprep.subr.bf16.mxu1 %v3167_v1 }
  0x82   :  { %570 = vmatmul.mubr.bf16.vlgmr.msra.gmra.mrb[4].mxu0 %v2840_v54  ;;  %613 = vmatmul.mubr.bf16.vlgmr.msra.gmra.mrb[4].mxu1 %v2840_v54  ;;  %v5440_v54 = vld [vmem:[#allocation3_spill] sm:$0xff] }
  0x83   :  { %705 = vmatpush1.bf16.msra.mxu0 %v3173_v2  ;;  %748 = vmatpush1.bf16.msra.mxu1 %v3178_v3 }
  0x84   :  { %706 = vmatprep.subr.bf16.mxu0 %v3184_v4  ;;  %749 = vmatprep.subr.bf16.mxu1 %v3191_v5 }
  0x85   :  { %736 = vmatprep.mubr.bf16.mxu0 %v2845_v60  ;;  %779 = vmatprep.mubr.bf16.mxu1 %v2845_v60  ;;  %v5441_v60 = vld [vmem:[#allocation5_spill] sm:$0xff] }
  0x87   :  { %707 = vmatpush1.bf16.msra.mxu0 %v3196_v6  ;;  %750 = vmatpush1.bf16.msra.mxu1 %v3202_v7 }
  0x88   :  { %708 = vmatprep.subr.bf16.mxu0 %v3208_v8  ;;  %751 = vmatprep.subr.bf16.mxu1 %v3213_v9 }
  0x8b   :  { %709 = vmatpush1.bf16.msra.mxu0 %v3218_v10  ;;  %752 = vmatpush1.bf16.msra.mxu1 %v3223_v11 }
  0x8c   :  { %710 = vmatprep.subr.bf16.mxu0 %v3230_v12  ;;  %753 = vmatprep.subr.bf16.mxu1 %v3237_v13 }
  0x8f   :  { %711 = vmatpush1.bf16.msra.mxu0 %v3242_v14  ;;  %754 = vmatpush1.bf16.msra.mxu1 %v3249_v15 }
  0x90   :  { %712 = vmatprep.subr.bf16.mxu0 %v3254_v16  ;;  %755 = vmatprep.subr.bf16.mxu1 %v3261_v17 }
  0x93   :  { %713 = vmatpush1.bf16.msra.mxu0 %v3266_v18  ;;  %756 = vmatpush1.bf16.msra.mxu1 %v3271_v19 }
  0x94   :  { %714 = vmatprep.subr.bf16.mxu0 %v3278_v20  ;;  %757 = vmatprep.subr.bf16.mxu1 %v3285_v21 }
  0x97   :  { %715 = vmatpush1.bf16.msra.mxu0 %v3290_v22  ;;  %758 = vmatpush1.bf16.msra.mxu1 %v3297_v23 }
  0x98   :  { %716 = vmatprep.subr.bf16.mxu0 %v3302_v24  ;;  %759 = vmatprep.subr.bf16.mxu1 %v3309_v25 }
  0x9b   :  { %717 = vmatpush1.bf16.msra.mxu0 %v3314_v26  ;;  %760 = vmatpush1.bf16.msra.mxu1 %v3319_v27 }
  0x9c   :  { %718 = vmatprep.subr.bf16.mxu0 %v3326_v28  ;;  %761 = vmatprep.subr.bf16.mxu1 %v3333_v29 }
  0x9f   :  { %719 = vmatpush1.bf16.msra.mxu0 %v3338_v30  ;;  %762 = vmatpush1.bf16.msra.mxu1 %v3345_v31 }
  0xa0   :  { %720 = vmatprep.subr.bf16.mxu0 %v3350_v32  ;;  %763 = vmatprep.subr.bf16.mxu1 %v3357_v33 }
  0xa3   :  { %721 = vmatpush1.bf16.msra.mxu0 %v3362_v34  ;;  %764 = vmatpush1.bf16.msra.mxu1 %v3367_v35 }
  0xa4   :  { %722 = vmatprep.subr.bf16.mxu0 %v3374_v36  ;;  %765 = vmatprep.subr.bf16.mxu1 %v3381_v37 }
  0xa7   :  { %723 = vmatpush1.bf16.msra.mxu0 %v3386_v38  ;;  %766 = vmatpush1.bf16.msra.mxu1 %v3393_v39 }
  0xa8   :  { %724 = vmatprep.subr.bf16.mxu0 %v3398_v40  ;;  %767 = vmatprep.subr.bf16.mxu1 %v3405_v41 }
  0xab   :  { %725 = vmatpush1.bf16.msra.mxu0 %v3410_v42  ;;  %768 = vmatpush1.bf16.msra.mxu1 %v3415_v43 }
  0xac   :  { %726 = vmatprep.subr.bf16.mxu0 %v3422_v44  ;;  %769 = vmatprep.subr.bf16.mxu1 %v3429_v45 }
  0xaf   :  { %727 = vmatpush1.bf16.msra.mxu0 %v3434_v46  ;;  %770 = vmatpush1.bf16.msra.mxu1 %v3439_v47 }
  0xb0   :  { %728 = vmatprep.subr.bf16.mxu0 %v3449_v49  ;;  %771 = vmatprep.subr.bf16.mxu1 %v3456_v50 }
  0xb3   :  { %729 = vmatpush1.bf16.msra.mxu0 %v3461_v51  ;;  %772 = vmatpush1.bf16.msra.mxu1 %v3466_v52 }
  0xb4   :  { %730 = vmatprep.subr.bf16.mxu0 %v3475_v53  ;;  %773 = vmatprep.subr.bf16.mxu1 %v5440_v54  ;;  %v2843_v54 = vld [vmem:[%s5288_s0 + $0x20] ss:$8 sps:$4 sm:$0xff]  }
  0xb7   :  { %731 = vmatpush1.bf16.msra.mxu0 %v3487_v55  ;;  %774 = vmatpush1.bf16.msra.mxu1 %v3492_v56 }
  0xb8   :  { %732 = vmatprep.subr.bf16.mxu0 %v3499_v57  ;;  %775 = vmatprep.subr.bf16.mxu1 %v3504_v58 }
  0xbb   :  { %733 = vmatpush1.bf16.msra.mxu0 %v5438_v59  ;;  %776 = vmatpush1.bf16.msra.mxu1 %v5441_v60  ;;  %v2848_v60 = vld [vmem:[%s5288_s0 + $0x34] ss:$8 sps:$4 sm:$0xff]  }
  0xbc   :  { %734 = vmatprep.subr.bf16.mxu0 %v3523_v61  ;;  %777 = vmatprep.subr.bf16.mxu1 %v3528_v62 }
  0xbf   :  { %735 = vmatpush1.bf16.msra.mxu0 %v3535_v63  ;;  %778 = vmatpush1.bf16.msra.mxu1 %v3540_v48 }
  0xc0   :  { %800 = vmatprep.subr.bf16.mxu0 %v3162_v0  ;;  %843 = vmatprep.subr.bf16.mxu1 %v3167_v1  ;;  %v5442_v1 = vld [vmem:[#allocation3_spill] sm:$0xff] }
  0xc2   :  { %737 = vmatmul.mubr.bf16.vlgmr.msra.gmra.mrb[8].mxu0 %v2843_v54  ;;  %780 = vmatmul.mubr.bf16.vlgmr.msra.gmra.mrb[8].mxu1 %v2843_v54  ;;  %v4050_v54 = vld [vmem:[%s5287_s2 + $0xac] ss:$16 sps:$4 sm:$0xff]  }
  0xc3   :  { %801 = vmatpush1.bf16.msra.mxu0 %v3173_v2  ;;  %844 = vmatpush1.bf16.msra.mxu1 %v3178_v3  ;;  %v5443_v3 = vld [vmem:[#allocation5_spill] sm:$0xff]  ;;  %5459 = vst [vmem:[#allocation18_spill] sm:$0xff] %v4050_v54 }
  0xc4   :  { %802 = vmatprep.subr.bf16.mxu0 %v3184_v4  ;;  %845 = vmatprep.subr.bf16.mxu1 %v3191_v5  ;;  %v2846_v5 = vld [vmem:[%s5288_s0 + $0x30] ss:$8 sps:$4 sm:$0xff]  }
  0xc5   :  { %832 = vmatprep.mubr.bf16.mxu0 %v2848_v60  ;;  %875 = vmatprep.mubr.bf16.mxu1 %v2848_v60 }
  0xc7   :  { %803 = vmatpush1.bf16.msra.mxu0 %v3196_v6  ;;  %846 = vmatpush1.bf16.msra.mxu1 %v3202_v7 }
  0xc8   :  { %804 = vmatprep.subr.bf16.mxu0 %v3208_v8  ;;  %847 = vmatprep.subr.bf16.mxu1 %v3213_v9 }
  0xcb   :  { %805 = vmatpush1.bf16.msra.mxu0 %v3218_v10  ;;  %848 = vmatpush1.bf16.msra.mxu1 %v3223_v11 }
  0xcc   :  { %806 = vmatprep.subr.bf16.mxu0 %v3230_v12  ;;  %849 = vmatprep.subr.bf16.mxu1 %v3237_v13 }
  0xcf   :  { %807 = vmatpush1.bf16.msra.mxu0 %v3242_v14  ;;  %850 = vmatpush1.bf16.msra.mxu1 %v3249_v15  ;;  %v3799_v15 = vld [vmem:[%s5288_s0 + $0x44] ss:$8 sps:$4 sm:$0xff]  }
  0xd0   :  { %808 = vmatprep.subr.bf16.mxu0 %v3254_v16  ;;  %851 = vmatprep.subr.bf16.mxu1 %v3261_v17  ;;  %v3811_v17 = vld [vmem:[%s5289_s4 + $0x104] ss:$8 sps:$4 sm:$0xff]  }
  0xd3   :  { %809 = vmatpush1.bf16.msra.mxu0 %v3266_v18  ;;  %852 = vmatpush1.bf16.msra.mxu1 %v3271_v19  ;;  %v3824_v19 = vld [vmem:[%s5289_s4 + $0x110] ss:$8 sps:$4 sm:$0xff]  }
  0xd4   :  { %810 = vmatprep.subr.bf16.mxu0 %v3278_v20  ;;  %853 = vmatprep.subr.bf16.mxu1 %v3285_v21  ;;  %v3838_v21 = vld [vmem:[%s5289_s4 + $0x120] ss:$8 sps:$4 sm:$0xff]  }
  0xd7   :  { %811 = vmatpush1.bf16.msra.mxu0 %v3290_v22  ;;  %854 = vmatpush1.bf16.msra.mxu1 %v3297_v23  ;;  %v3852_v23 = vld [vmem:[%s5289_s4 + $0x130] ss:$8 sps:$4 sm:$0xff]  }
  0xd8   :  { %812 = vmatprep.subr.bf16.mxu0 %v3302_v24  ;;  %855 = vmatprep.subr.bf16.mxu1 %v3309_v25  ;;  %v3866_v25 = vld [vmem:[%s5289_s4 + $0x140] ss:$8 sps:$4 sm:$0xff]  }
  0xdb   :  { %813 = vmatpush1.bf16.msra.mxu0 %v3314_v26  ;;  %856 = vmatpush1.bf16.msra.mxu1 %v3319_v27  ;;  %v3879_v27 = vld [vmem:[%s5289_s4 + $0x150] ss:$8 sps:$4 sm:$0xff]  }
  0xdc   :  { %814 = vmatprep.subr.bf16.mxu0 %v3326_v28  ;;  %857 = vmatprep.subr.bf16.mxu1 %v3333_v29  ;;  %v3893_v29 = vld [vmem:[%s5289_s4 + $0x160] ss:$8 sps:$4 sm:$0xff]  }
  0xdf   :  { %815 = vmatpush1.bf16.msra.mxu0 %v3338_v30  ;;  %858 = vmatpush1.bf16.msra.mxu1 %v3345_v31  ;;  %v3907_v31 = vld [vmem:[%s5289_s4 + $0x170] ss:$8 sps:$4 sm:$0xff]  }
  0xe0   :  { %816 = vmatprep.subr.bf16.mxu0 %v3350_v32  ;;  %859 = vmatprep.subr.bf16.mxu1 %v3357_v33  ;;  %v3921_v33 = vld [vmem:[%s5289_s4 + $0x180] ss:$8 sps:$4 sm:$0xff]  }
  0xe3   :  { %817 = vmatpush1.bf16.msra.mxu0 %v3362_v34  ;;  %860 = vmatpush1.bf16.msra.mxu1 %v3367_v35  ;;  %v3935_v35 = vld [vmem:[%s5288_s0 + $0x40] ss:$8 sps:$4 sm:$0xff]  }
  0xe4   :  { %818 = vmatprep.subr.bf16.mxu0 %v3374_v36  ;;  %861 = vmatprep.subr.bf16.mxu1 %v3381_v37  ;;  %v3945_v37 = vld [vmem:[%s5289_s4 + $0x1a4] ss:$8 sps:$4 sm:$0xff]  }
  0xe7   :  { %819 = vmatpush1.bf16.msra.mxu0 %v3386_v38  ;;  %862 = vmatpush1.bf16.msra.mxu1 %v3393_v39  ;;  %v3961_v39 = vld [vmem:[%s5289_s4 + $0x1a0] ss:$8 sps:$4 sm:$0xff]  }
  0xe8   :  { %820 = vmatprep.subr.bf16.mxu0 %v3398_v40  ;;  %863 = vmatprep.subr.bf16.mxu1 %v3405_v41  ;;  %5445 = vst [vmem:[#allocation3_spill] sm:$0xff] %v3961_v39  ;;  %v3973_v41 = vld [vmem:[%s5289_s4 + $0x1b4] ss:$8 sps:$4 sm:$0xff]  }
  0xe9   :  { %5447 = vst [vmem:[#allocation6_spill] sm:$0xff] %v3973_v41 }
  0xeb   :  { %821 = vmatpush1.bf16.msra.mxu0 %v3410_v42  ;;  %864 = vmatpush1.bf16.msra.mxu1 %v3415_v43  ;;  %v3986_v43 = vld [vmem:[%s5289_s4 + $0x1b0] ss:$8 sps:$4 sm:$0xff]  }
  0xec   :  { %822 = vmatprep.subr.bf16.mxu0 %v3422_v44  ;;  %865 = vmatprep.subr.bf16.mxu1 %v3429_v45  ;;  %5449 = vst [vmem:[#allocation8_spill] sm:$0xff] %v3986_v43  ;;  %v3998_v45 = vld [vmem:[%s5289_s4 + $0x1c4] ss:$8 sps:$4 sm:$0xff]  }
  0xed   :  { %5451 = vst [vmem:[#allocation10_spill] sm:$0xff] %v3998_v45 }
  0xef   :  { %823 = vmatpush1.bf16.msra.mxu0 %v3434_v46  ;;  %866 = vmatpush1.bf16.msra.mxu1 %v3439_v47  ;;  %v636_v47 = vlaneseq }
  0xf0   :  { %824 = vmatprep.subr.bf16.mxu0 %v3449_v49  ;;  %867 = vmatprep.subr.bf16.mxu1 %v3456_v50  ;;  %v4015_v50 = vld [vmem:[%s5287_s2 + $0x48] ss:$16 sps:$4 sm:$0xff]  }
  0xf1   :  { %5454 = vst [vmem:[#allocation13_spill] sm:$0xff] %v4015_v50 }
  0xf3   :  { %825 = vmatpush1.bf16.msra.mxu0 %v3461_v51  ;;  %868 = vmatpush1.bf16.msra.mxu1 %v3466_v52  ;;  %v637_v52 = vshrl.u32 %v636_v47, 7 }
  0xf4   :  { %826 = vmatprep.subr.bf16.mxu0 %v3475_v53  ;;  %869 = vmatprep.subr.bf16.mxu1 %v5442_v1 }
  0xf7   :  { %827 = vmatpush1.bf16.msra.mxu0 %v3487_v55  ;;  %870 = vmatpush1.bf16.msra.mxu1 %v3492_v56 }
  0xf8   :  { %828 = vmatprep.subr.bf16.mxu0 %v3499_v57  ;;  %871 = vmatprep.subr.bf16.mxu1 %v3504_v58 }
  0xfb   :  { %829 = vmatpush1.bf16.msra.mxu0 %v5438_v59  ;;  %872 = vmatpush1.bf16.msra.mxu1 %v5443_v3 }
  0xfc   :  { %830 = vmatprep.subr.bf16.mxu0 %v3523_v61  ;;  %873 = vmatprep.subr.bf16.mxu1 %v3528_v62 }
  0xff   :  { %831 = vmatpush1.bf16.msra.mxu0 %v3535_v63  ;;  %874 = vmatpush1.bf16.msra.mxu1 %v3540_v48 }
 0x100   :  { %1363 = vmatprep.subr.bf16.mxu1 %v3162_v0  ;;  %1101 = vmatprep.subr.bf16.mxu0 %v3811_v17 }
 0x102   :  { %833 = vmatmul.mubr.bf16.vlgmr.msra.gmra.mrb[12].mxu0 %v2846_v5  ;;  %876 = vmatmul.mubr.bf16.vlgmr.msra.gmra.mrb[12].mxu1 %v2846_v5 }
 0x103   :  { %1364 = vmatpush1.bf16.msra.mxu1 %v3173_v2  ;;  %1395 = vmatprep.mubr.bf16.mxu1 %v3799_v15 }
 0x104   :  { %1365 = vmatprep.subr.bf16.mxu1 %v3184_v4 }
 0x107   :  { %1366 = vmatpush1.bf16.msra.mxu1 %v3196_v6 }
 0x108   :  { %1367 = vmatprep.subr.bf16.mxu1 %v3208_v8  ;;  %v4063_v8 = vld [vmem:[%s5289_s4 + $0x1d0] ss:$8 sps:$4 sm:$0xff]  }
 0x10b   :  { %1368 = vmatpush1.bf16.msra.mxu1 %v3218_v10 }
 0x10c   :  { %1369 = vmatprep.subr.bf16.mxu1 %v3230_v12 }
 0x10f   :  { %1370 = vmatpush1.bf16.msra.mxu1 %v3242_v14 }
 0x110   :  { %1371 = vmatprep.subr.bf16.mxu1 %v3254_v16  ;;  %v3804_v16 = vld [vmem:[%s5289_s4 + $0x100] ss:$8 sps:$4 sm:$0xff]  }
 0x111   :  { %1102 = vmatpush1.bf16.msra.mxu0 %v3804_v16 }
 0x113   :  { %1372 = vmatpush1.bf16.msra.mxu1 %v3266_v18  ;;  %v3817_v18 = vld [vmem:[%s5289_s4 + $0x114] ss:$8 sps:$4 sm:$0xff]  }
 0x114   :  { %1373 = vmatprep.subr.bf16.mxu1 %v3278_v20  ;;  %1103 = vmatprep.subr.bf16.mxu0 %v3817_v18  ;;  %v3831_v20 = vld [vmem:[%s5289_s4 + $0x124] ss:$8 sps:$4 sm:$0xff]  }
 0x115   :  { %v3770_v0 = vpop.f32.mrb[0].mxu0  ;;  %v3772_v2 = vpop.f32.mrb[0].mxu1  ;;  %1104 = vmatpush1.bf16.msra.mxu0 %v3824_v19 }
 0x116   :  { %v3776_v6 = vpop.f32.mrb[1].mxu0  ;;  %v3778_v7 = vpop.f32.mrb[1].mxu1  ;;  %1105 = vmatprep.subr.bf16.mxu0 %v3831_v20 }
 0x117   :  { %v3782_v9 = vpop.f32.mrb[2].mxu0  ;;  %v3784_v10 = vpop.f32.mrb[2].mxu1  ;;  %1374 = vmatpush1.bf16.msra.mxu1 %v3290_v22  ;;  %v3845_v22 = vld [vmem:[%s5289_s4 + $0x134] ss:$8 sps:$4 sm:$0xff]  }
 0x118   :  { %v3789_v12 = vpop.f32.mrb[3].mxu0  ;;  %v3791_v13 = vpop.f32.mrb[3].mxu1  ;;  %1375 = vmatprep.subr.bf16.mxu1 %v3302_v24  ;;  %v3859_v24 = vld [vmem:[%s5289_s4 + $0x144] ss:$8 sps:$4 sm:$0xff]  }
 0x119   :  { %1106 = vmatpush1.bf16.msra.mxu0 %v3838_v21 }
 0x11a   :  { %1107 = vmatprep.subr.bf16.mxu0 %v3845_v22 }
 0x11b   :  { %1376 = vmatpush1.bf16.msra.mxu1 %v3314_v26  ;;  %v3873_v26 = vld [vmem:[%s5289_s4 + $0x154] ss:$8 sps:$4 sm:$0xff]  }
 0x11c   :  { %1377 = vmatprep.subr.bf16.mxu1 %v3326_v28  ;;  %v3884_v28 = vld [vmem:[%s5289_s4 + $0x164] ss:$8 sps:$4 sm:$0xff]  }
 0x11d   :  { %1108 = vmatpush1.bf16.msra.mxu0 %v3852_v23 }
 0x11e   :  { %1109 = vmatprep.subr.bf16.mxu0 %v3859_v24 }
 0x11f   :  { %1378 = vmatpush1.bf16.msra.mxu1 %v3338_v30  ;;  %v3898_v30 = vld [vmem:[%s5289_s4 + $0x174] ss:$8 sps:$4 sm:$0xff]  }
 0x120   :  { %1379 = vmatprep.subr.bf16.mxu1 %v3350_v32  ;;  %v3912_v32 = vld [vmem:[%s5289_s4 + $0x184] ss:$8 sps:$4 sm:$0xff]  }
 0x121   :  { %1110 = vmatpush1.bf16.msra.mxu0 %v3866_v25 }
 0x122   :  { %1111 = vmatprep.subr.bf16.mxu0 %v3873_v26 }
 0x123   :  { %1380 = vmatpush1.bf16.msra.mxu1 %v3362_v34  ;;  %v3926_v34 = vld [vmem:[%s5289_s4 + $0x194] ss:$8 sps:$4 sm:$0xff]  }
 0x124   :  { %1381 = vmatprep.subr.bf16.mxu1 %v3374_v36  ;;  %v3940_v36 = vld [vmem:[%s5289_s4 + $0x190] ss:$8 sps:$4 sm:$0xff]  }
 0x125   :  { %1112 = vmatpush1.bf16.msra.mxu0 %v3879_v27 }
 0x126   :  { %1113 = vmatprep.subr.bf16.mxu0 %v3884_v28 }
 0x127   :  { %1382 = vmatpush1.bf16.msra.mxu1 %v3386_v38  ;;  %v3953_v38 = vld [vmem:[%s5287_s2 + $0xc] ss:$16 sps:$4 sm:$0xff]  }
 0x128   :  { %1383 = vmatprep.subr.bf16.mxu1 %v3398_v40  ;;  %5444 = vst [vmem:[#allocation4_spill] sm:$0xff] %v3953_v38  ;;  %v3966_v40 = vld [vmem:[%s5287_s2 + $0x8] ss:$16 sps:$4 sm:$0xff]  }
 0x129   :  { %1114 = vmatpush1.bf16.msra.mxu0 %v3893_v29  ;;  %5446 = vst [vmem:[#allocation5_spill] sm:$0xff] %v3966_v40 }
 0x12a   :  { %1115 = vmatprep.subr.bf16.mxu0 %v3898_v30 }
 0x12b   :  { %1384 = vmatpush1.bf16.msra.mxu1 %v3410_v42  ;;  %v3978_v42 = vld [vmem:[%s5287_s2 + $0x2c] ss:$16 sps:$4 sm:$0xff]  }
 0x12c   :  { %1385 = vmatprep.subr.bf16.mxu1 %v3422_v44  ;;  %5448 = vst [vmem:[#allocation7_spill] sm:$0xff] %v3978_v42  ;;  %v3991_v44 = vld [vmem:[%s5287_s2 + $0x28] ss:$16 sps:$4 sm:$0xff]  }
 0x12d   :  { %1116 = vmatpush1.bf16.msra.mxu0 %v3907_v31  ;;  %5450 = vst [vmem:[#allocation9_spill] sm:$0xff] %v3991_v44 }
 0x12e   :  { %1117 = vmatprep.subr.bf16.mxu0 %v3912_v32 }
 0x12f   :  { %1386 = vmatpush1.bf16.msra.mxu1 %v3434_v46  ;;  %v4003_v46 = vld [vmem:[%s5287_s2 + $0x4c] ss:$16 sps:$4 sm:$0xff]  }
 0x130   :  { %1387 = vmatprep.subr.bf16.mxu1 %v3449_v49  ;;  %5452 = vst [vmem:[#allocation11_spill] sm:$0xff] %v4003_v46  ;;  %v4010_v49 = vld [vmem:[%s5289_s4 + $0x1c0] ss:$8 sps:$4 sm:$0xff]  }
 0x131   :  { %1118 = vmatpush1.bf16.msra.mxu0 %v3921_v33  ;;  %5453 = vst [vmem:[#allocation12_spill] sm:$0xff] %v4010_v49 }
 0x132   :  { %1119 = vmatprep.subr.bf16.mxu0 %v3926_v34 }
 0x133   :  { %1388 = vmatpush1.bf16.msra.mxu1 %v3461_v51  ;;  %v4022_v51 = vld [vmem:[%s5287_s2 + $0x6c] ss:$16 sps:$4 sm:$0xff]  }
 0x134   :  { %1389 = vmatprep.subr.bf16.mxu1 %v3475_v53  ;;  %5455 = vst [vmem:[#allocation14_spill] sm:$0xff] %v4022_v51  ;;  %v4029_v53 = vld [vmem:[%s5287_s2 + $0x68] ss:$16 sps:$4 sm:$0xff]  }
 0x135   :  { %1120 = vmatpush1.bf16.msra.mxu0 %v3940_v36  ;;  %5456 = vst [vmem:[#allocation15_spill] sm:$0xff] %v4029_v53 }
 0x136   :  { %1121 = vmatprep.subr.bf16.mxu0 %v3945_v37 }
 0x137   :  { %1390 = vmatpush1.bf16.msra.mxu1 %v3487_v55  ;;  %v4035_v55 = vld [vmem:[%s5287_s2 + $0x8c] ss:$16 sps:$4 sm:$0xff]  }
 0x138   :  { %1391 = vmatprep.subr.bf16.mxu1 %v3499_v57  ;;  %5457 = vst [vmem:[#allocation16_spill] sm:$0xff] %v4035_v55  ;;  %v638_v57 = vsub.s32 0, %v637_v52 }
 0x139   :  { %1122 = vmatpush1.bf16.msra.mxu0 %v3961_v39 }
 0x13a   :  { %1123 = vmatprep.subr.bf16.mxu0 %v3973_v41  ;;  %v4070_v41 = vld [vmem:[%s5287_s2 + $0xa8] ss:$16 sps:$4 sm:$0xff]  }
 0x13b   :  { %1392 = vmatpush1.bf16.msra.mxu1 %v5438_v59  ;;  %v4044_v59 = vld [vmem:[%s5287_s2 + $0x88] ss:$16 sps:$4 sm:$0xff]   ;;  %5461 = vst [vmem:[#allocation20_spill] sm:$0xff] %v4070_v41 }
 0x13c   :  { %1393 = vmatprep.subr.bf16.mxu1 %v3523_v61  ;;  %v105_v61 = vld [vmem:[%s5290_s3] sm:$0x3]  ;;  %5458 = vst [vmem:[#allocation17_spill] sm:$0xff] %v4044_v59 }
 0x13d   :  { %1124 = vmatpush1.bf16.msra.mxu0 %v3986_v43 }
 0x13e   :  { %1125 = vmatprep.subr.bf16.mxu0 %v3998_v45 }
 0x13f   :  { %1394 = vmatpush1.bf16.msra.mxu1 %v3535_v63  ;;  %v642_v63 = vsub.s32 1, %v637_v52  ;;  %v4058_v52 = vrot.slane %v105_v61, %v638_v57  ;;  %v5462_v57 = vmax.f32 %v3770_v0, %v3772_v2  ;;  %v4090_v0 = vld [vmem:[%s5289_s4 + $0x1e4] ss:$8 sps:$4 sm:$0xff]  }
 0x140   :  { %1406 = vmatprep.subr.bf16.mxu1 %v3953_v38 }
 0x141   :  { %1126 = vmatpush1.bf16.msra.mxu0 %v4010_v49  ;;  %v4065_v49 = vrot.slane %v105_v61, %v642_v63  ;;  %v5464_v61 = vmax.f32 %v3776_v6, %v3778_v7 }
 0x142   :  { %1396 = vmatmul.mubr.bf16.vlgmr.msra.gmra.mrb[16].mxu1 %v3935_v35 }
 0x143   :  { %1407 = vmatpush1.bf16.msra.mxu1 %v3966_v40  ;;  %1438 = vmatprep.mubr.bf16.mxu1 %v3799_v15  ;;  %v4056_v15 = vld [vmem:[%s5289_s4 + $0x1d4] ss:$8 sps:$4 sm:$0xff]  }
 0x144   :  { %1408 = vmatprep.subr.bf16.mxu1 %v3978_v42  ;;  %5460 = vst [vmem:[#allocation19_spill] sm:$0xff] %v4056_v15  ;;  %1127 = vmatprep.subr.bf16.mxu0 %v4056_v15 }
 0x145   :  { %1128 = vmatpush1.bf16.msra.mxu0 %v4063_v8 }
 0x146   :  { %1129 = vmatprep.subr.bf16.mxu0 %v4090_v0 }
 0x147   :  { %1409 = vmatpush1.bf16.msra.mxu1 %v3991_v44 }
 0x148   :  { %1410 = vmatprep.subr.bf16.mxu1 %v4003_v46 }
 0x14b   :  { %1411 = vmatpush1.bf16.msra.mxu1 %v4015_v50 }
 0x14c   :  { %1412 = vmatprep.subr.bf16.mxu1 %v4022_v51 }
 0x14f   :  { %1413 = vmatpush1.bf16.msra.mxu1 %v4029_v53 }
 0x150   :  { %1414 = vmatprep.subr.bf16.mxu1 %v4035_v55 }
 0x153   :  { %1415 = vmatpush1.bf16.msra.mxu1 %v4044_v59 }
 0x154   :  { %1416 = vmatprep.subr.bf16.mxu1 %v4050_v54 }
 0x155   :  { %v571_v60 = vpop.f32.mrb[4].mxu0  ;;  %v614_v5 = vpop.f32.mrb[4].mxu1 }
 0x156   :  { %v627_v47 = vmax.f32 %v571_v60, %v614_v5  ;;  %v573_v14 = vpop.f32.mrb[5].mxu0  ;;  %v616_v11 = vpop.f32.mrb[5].mxu1 }
 0x157   :  { %v628_v4 = vmax.f32 %v573_v14, %v616_v11  ;;  %v575_v45 = vpop.f32.mrb[6].mxu0  ;;  %v618_v43 = vpop.f32.mrb[6].mxu1  ;;  %1417 = vmatpush1.bf16.msra.mxu1 %v4070_v41  ;;  %v4080_v14 = vld [vmem:[%s5287_s2 + $0xcc] ss:$16 sps:$4 sm:$0xff]  }
 0x158   :  { %v631_v60 = vmax.f32 %v5462_v57, %v627_v47  ;;  %v629_v5 = vmax.f32 %v575_v45, %v618_v43  ;;  %v577_v39 = vpop.f32.mrb[7].mxu0  ;;  %v620_v11 = vpop.f32.mrb[7].mxu1  ;;  %5463 = vst [vmem:[#allocation21_spill] sm:$0xff] %v4080_v14  ;;  %1418 = vmatprep.subr.bf16.mxu1 %v4080_v14  ;;  %v5465_v43 = vmax.f32 %v3782_v9, %v3784_v10  ;;  %v4099_v47 = vld [vmem:[%s5289_s4 + $0x1e0] ss:$8 sps:$4 sm:$0xff]  }
 0x159   :  { %v632_v63 = vmax.f32 %v5464_v61, %v628_v4  ;;  %v630_v15 = vmax.f32 %v577_v39, %v620_v11  ;;  %v5466_v4 = vmax.f32 %v3789_v12, %v3791_v13  ;;  %v4108_v39 = vld [vmem:[%s5287_s2 + $0xc8] ss:$16 sps:$4 sm:$0xff]   ;;  %v4116_v10 = vld [vmem:[%s5287_s2 + $0xec] ss:$16 sps:$4 sm:$0xff]   ;;  %1130 = vmatpush1.bf16.msra.mxu0 %v4099_v47 }
 0x15a   :  { %v646_v2 = vadd.f32 %v4058_v52, %v631_v60  ;;  %v633_v45 = vmax.f32 %v5465_v43, %v629_v5  ;;  %5467 = vst [vmem:[#allocation22_spill] sm:$0xff] %v4108_v39  ;;  %5468 = vst [vmem:[#allocation23_spill] sm:$0xff] %v4116_v10  ;;  %v4124_v13 = vld [vmem:[%s5289_s4 + $0x1f4] ss:$8 sps:$4 sm:$0xff]   ;;  %v4129_v60 = vld [vmem:[%s5289_s4 + $0x1f0] ss:$8 sps:$4 sm:$0xff]  }
 0x15b   :  { %v647_v6 = vadd.f32 %v4065_v49, %v632_v63  ;;  %v634_v7 = vmax.f32 %v5466_v4, %v630_v15  ;;  %1419 = vmatpush1.bf16.msra.mxu1 %v4108_v39  ;;  %v4134_v61 = vld [vmem:[%s5287_s2 + $0xe8] ss:$16 sps:$4 sm:$0xff]   ;;  %1131 = vmatprep.subr.bf16.mxu0 %v4124_v13  ;;  %v4150_v43 = vld [vmem:[%s5289_s4 + $0x4] ss:$8 sps:$4 sm:$0xff]  }
 0x15c   :  { %v648_v9 = vadd.f32 %v4058_v52, %v633_v45  ;;  %1420 = vmatprep.subr.bf16.mxu1 %v4116_v10  ;;  %v650_v15 = vmax.f32 %v646_v2, 0.0  ;;  %5469 = vst [vmem:[#allocation24_spill] sm:$0xff] %v4134_v61  ;;  %v4143_v2 = vld [vmem:[%s5287_s2 + $0x10c] ss:$16 sps:$4 sm:$0xff]  }
 0x15d   :  { %v649_v12 = vadd.f32 %v4065_v49, %v634_v7  ;;  %v651_v5 = vmax.f32 %v647_v6, 0.0  ;;  %5470 = vst [vmem:[#allocation25_spill] sm:$0xff] %v4143_v2  ;;  %1132 = vmatpush1.bf16.msra.mxu0 %v4129_v60  ;;  %v4157_v6 = vld [vmem:[%s5287_s2 + $0x108] ss:$16 sps:$4 sm:$0xff]   ;;  %v4164_v4 = vld [vmem:[%s5287_s2 + $0x12c] ss:$16 sps:$4 sm:$0xff]  }
 0x15e   :  { %v652_v57 = vmax.f32 %v648_v9, 0.0  ;;  %5471 = vst [vmem:[#allocation26_spill] sm:$0xff] %v4157_v6  ;;  %1304 = vmatprep.subr.bf16.mxu0 %v4150_v43  ;;  %5472 = vst [vmem:[#allocation27_spill] sm:$0xff] %v4164_v4  ;;  %v4170_v7 = vld [vmem:[%s5287_s2 + $0x128] ss:$16 sps:$4 sm:$0xff]  }
 0x15f   :  { %v653_v11 = vmax.f32 %v649_v12, 0.0  ;;  %1421 = vmatpush1.bf16.msra.mxu1 %v4134_v61  ;;  %5473 = vst [vmem:[#allocation28_spill] sm:$0xff] %v4170_v7  ;;  %v4176_v9 = vld [vmem:[%s5287_s2 + $0x14c] ss:$16 sps:$4 sm:$0xff]   ;;  %v4182_v12 = vld [vmem:[%s5287_s2 + $0x148] ss:$16 sps:$4 sm:$0xff]  }
 0x160   :  { %v4138_v63 = vpack.c.bf16 %v652_v57, %v650_v15  ;;  %1422 = vmatprep.subr.bf16.mxu1 %v4143_v2  ;;  %5474 = vst [vmem:[#allocation29_spill] sm:$0xff] %v4176_v9  ;;  %5475 = vst [vmem:[#allocation30_spill] sm:$0xff] %v4182_v12  ;;  %v4188_v15 = vld [vmem:[%s5287_s2 + $0x16c] ss:$16 sps:$4 sm:$0xff]   ;;  %v4194_v57 = vld [vmem:[%s5287_s2 + $0x168] ss:$16 sps:$4 sm:$0xff]  }
 0x161   :  { %v4152_v45 = vpack.c.bf16 %v653_v11, %v651_v5  ;;  %5476 = vst [vmem:[#allocation31_spill] sm:$0xff] %v4188_v15  ;;  %5477 = vst [vmem:[#allocation32_spill] sm:$0xff] %v4194_v57  ;;  %v4200_v5 = vld [vmem:[%s5287_s2 + $0x18c] ss:$16 sps:$4 sm:$0xff]   ;;  %v4206_v11 = vld [vmem:[%s5287_s2 + $0x188] ss:$16 sps:$4 sm:$0xff]  }
 0x162   :  { %5478 = vst [vmem:[#allocation33_spill] sm:$0xff] %v4200_v5  ;;  %5479 = vst [vmem:[#allocation34_spill] sm:$0xff] %v4206_v11 }
 0x163   :  { %1423 = vmatpush1.bf16.msra.mxu1 %v4157_v6 }
 0x164   :  { %1424 = vmatprep.subr.bf16.mxu1 %v4164_v4 }
 0x167   :  { %1425 = vmatpush1.bf16.msra.mxu1 %v4170_v7 }
 0x168   :  { %1426 = vmatprep.subr.bf16.mxu1 %v4176_v9 }
 0x16b   :  { %1427 = vmatpush1.bf16.msra.mxu1 %v4182_v12 }
 0x16c   :  { %1428 = vmatprep.subr.bf16.mxu1 %v4188_v15 }
 0x16f   :  { %1429 = vmatpush1.bf16.msra.mxu1 %v4194_v57 }
 0x170   :  { %1430 = vmatprep.subr.bf16.mxu1 %v4200_v5 }
 0x173   :  { %1431 = vmatpush1.bf16.msra.mxu1 %v4206_v11 }
 0x174   :  { %1432 = vmatprep.subr.bf16.mxu1 %v5442_v1 }
 0x177   :  { %1433 = vmatpush1.bf16.msra.mxu1 %v3492_v56 }
 0x178   :  { %1434 = vmatprep.subr.bf16.mxu1 %v3504_v58 }
 0x17b   :  { %1435 = vmatpush1.bf16.msra.mxu1 %v5443_v3 }
 0x17c   :  { %1436 = vmatprep.subr.bf16.mxu1 %v3528_v62 }
 0x17f   :  { %1437 = vmatpush1.bf16.msra.mxu1 %v3540_v48 }
 0x180   :  { %1502 = vmatprep.subr.bf16.mxu1 %v3953_v38  ;;  %v4677_v38 = vld [vmem:[%s5287_s2 + $0x184] ss:$16 sps:$4 sm:$0xff]  }
 0x181   :  { %5513 = vst [vmem:[#allocation56_spill] sm:$0xff] %v4677_v38 }
 0x182   :  { %1439 = vmatmul.mubr.bf16.vlgmr.msra.gmra.mrb[20].mxu1 %v3935_v35 }
 0x183   :  { %1503 = vmatpush1.bf16.msra.mxu1 %v3966_v40  ;;  %v4665_v40 = vld [vmem:[%s5287_s2 + $0x164] ss:$16 sps:$4 sm:$0xff]  }
 0x184   :  { %1504 = vmatprep.subr.bf16.mxu1 %v3978_v42  ;;  %v4659_v42 = vld [vmem:[%s5287_s2 + $0x140] ss:$16 sps:$4 sm:$0xff]   ;;  %5511 = vst [vmem:[#allocation54_spill] sm:$0xff] %v4665_v40 }
 0x185   :  { %5510 = vst [vmem:[#allocation53_spill] sm:$0xff] %v4659_v42 }
 0x187   :  { %1505 = vmatpush1.bf16.msra.mxu1 %v3991_v44 }
 0x188   :  { %1506 = vmatprep.subr.bf16.mxu1 %v4003_v46 }
 0x18b   :  { %1507 = vmatpush1.bf16.msra.mxu1 %v4015_v50 }
 0x18c   :  { %1508 = vmatprep.subr.bf16.mxu1 %v4022_v51 }
 0x18f   :  { %1509 = vmatpush1.bf16.msra.mxu1 %v4029_v53  ;;  %v4653_v53 = vld [vmem:[%s5287_s2 + $0x144] ss:$16 sps:$4 sm:$0xff]  }
 0x190   :  { %1510 = vmatprep.subr.bf16.mxu1 %v4035_v55  ;;  %5509 = vst [vmem:[#allocation52_spill] sm:$0xff] %v4653_v53 }
 0x193   :  { %1511 = vmatpush1.bf16.msra.mxu1 %v4044_v59  ;;  %v4647_v59 = vld [vmem:[%s5287_s2 + $0x120] ss:$16 sps:$4 sm:$0xff]  }
 0x194   :  { %1512 = vmatprep.subr.bf16.mxu1 %v4050_v54  ;;  %v4641_v54 = vld [vmem:[%s5287_s2 + $0x124] ss:$16 sps:$4 sm:$0xff]   ;;  %5508 = vst [vmem:[#allocation51_spill] sm:$0xff] %v4647_v59 }
 0x195   :  { %v738_v56 = vpop.f32.mrb[8].mxu0  ;;  %v781_v58 = vpop.f32.mrb[8].mxu1  ;;  %5507 = vst [vmem:[#allocation50_spill] sm:$0xff] %v4641_v54 }
 0x196   :  { %v886_v62 = vmax.f32 %v738_v56, %v781_v58  ;;  %v740_v48 = vpop.f32.mrb[9].mxu0  ;;  %v783_v1 = vpop.f32.mrb[9].mxu1  ;;  %v4263_v56 = vld [vmem:[%s5287_s2 + $0x1c8] ss:$16 sps:$4 sm:$0xff]   ;;  %v4269_v58 = vld [vmem:[%s5287_s2 + $0x1ec] ss:$16 sps:$4 sm:$0xff]  }
 0x197   :  { %v887_v3 = vmax.f32 %v740_v48, %v783_v1  ;;  %v742_v35 = vpop.f32.mrb[10].mxu0  ;;  %v785_v46 = vpop.f32.mrb[10].mxu1  ;;  %1513 = vmatpush1.bf16.msra.mxu1 %v4070_v41  ;;  %5483 = vst [vmem:[#allocation38_spill] sm:$0xff] %v4263_v56  ;;  %5484 = vst [vmem:[#allocation39_spill] sm:$0xff] %v4269_v58  ;;  %v4275_v48 = vld [vmem:[%s5287_s2 + $0x1e8] ss:$16 sps:$4 sm:$0xff]  }
 0x198   :  { %v888_v50 = vmax.f32 %v742_v35, %v785_v46  ;;  %v744_v51 = vpop.f32.mrb[11].mxu0  ;;  %v787_v44 = vpop.f32.mrb[11].mxu1  ;;  %1514 = vmatprep.subr.bf16.mxu1 %v4080_v14  ;;  %v4251_v46 = vld [vmem:[%s5287_s2 + $0x1a8] ss:$16 sps:$4 sm:$0xff]   ;;  %5485 = vst [vmem:[#allocation40_spill] sm:$0xff] %v4275_v48 }
 0x199   :  { %v889_v55 = vmax.f32 %v744_v51, %v787_v44  ;;  %v4245_v44 = vld [vmem:[%s5287_s2 + $0x1ac] ss:$16 sps:$4 sm:$0xff]   ;;  %5481 = vst [vmem:[#allocation36_spill] sm:$0xff] %v4251_v46  ;;  %v4629_v14 = vld [vmem:[%s5287_s2 + $0x104] ss:$16 sps:$4 sm:$0xff]  }
 0x19a   :  { %5480 = vst [vmem:[#allocation35_spill] sm:$0xff] %v4245_v44  ;;  %v4257_v51 = vld [vmem:[%s5287_s2 + $0x1cc] ss:$16 sps:$4 sm:$0xff]   ;;  %v4635_v41 = vld [vmem:[%s5287_s2 + $0x100] ss:$16 sps:$4 sm:$0xff]  }
 0x19b   :  { %1515 = vmatpush1.bf16.msra.mxu1 %v4108_v39  ;;  %5482 = vst [vmem:[#allocation37_spill] sm:$0xff] %v4257_v51  ;;  %v4623_v39 = vld [vmem:[%s5287_s2 + $0xe0] ss:$16 sps:$4 sm:$0xff]  }
 0x19c   :  { %1516 = vmatprep.subr.bf16.mxu1 %v4116_v10  ;;  %v4617_v10 = vld [vmem:[%s5287_s2 + $0xe4] ss:$16 sps:$4 sm:$0xff]  }
 0x19f   :  { %1517 = vmatpush1.bf16.msra.mxu1 %v4134_v61  ;;  %v4611_v61 = vld [vmem:[%s5287_s2 + $0xc0] ss:$16 sps:$4 sm:$0xff]  }
 0x1a0   :  { %1518 = vmatprep.subr.bf16.mxu1 %v4143_v2 }
 0x1a3   :  { %1519 = vmatpush1.bf16.msra.mxu1 %v4157_v6 }
 0x1a4   :  { %1520 = vmatprep.subr.bf16.mxu1 %v4164_v4 }
 0x1a7   :  { %1521 = vmatpush1.bf16.msra.mxu1 %v4170_v7 }
 0x1a8   :  { %1522 = vmatprep.subr.bf16.mxu1 %v4176_v9 }
 0x1ab   :  { %1523 = vmatpush1.bf16.msra.mxu1 %v4182_v12 }
 0x1ac   :  { %1524 = vmatprep.subr.bf16.mxu1 %v4188_v15 }
 0x1af   :  { %1525 = vmatpush1.bf16.msra.mxu1 %v4194_v57 }
 0x1b0   :  { %1526 = vmatprep.subr.bf16.mxu1 %v4200_v5 }
 0x1b3   :  { %1527 = vmatpush1.bf16.msra.mxu1 %v4206_v11 }
 0x1b4   :  { %1528 = vmatprep.subr.bf16.mxu1 %v4245_v44 }
 0x1b7   :  { %1529 = vmatpush1.bf16.msra.mxu1 %v4251_v46 }
 0x1b8   :  { %1530 = vmatprep.subr.bf16.mxu1 %v4257_v51 }
 0x1bb   :  { %1531 = vmatpush1.bf16.msra.mxu1 %v4263_v56 }
 0x1bc   :  { %1532 = vmatprep.subr.bf16.mxu1 %v4269_v58 }
 0x1bf   :  { %1533 = vmatpush1.bf16.msra.mxu1 %v4275_v48 }
 0x1c0   :  { %1807 = vmatprep.subr.bf16.mxu1 %v3811_v17 }
 0x1d5   :  { %v834_v1 = vpop.f32.mrb[12].mxu0  ;;  %v877_v35 = vpop.f32.mrb[12].mxu1 }
 0x1d6   :  { %v890_v51 = vmax.f32 %v834_v1, %v877_v35  ;;  %v836_v56 = vpop.f32.mrb[13].mxu0  ;;  %v879_v46 = vpop.f32.mrb[13].mxu1 }
 0x1d7   :  { %v891_v44 = vmax.f32 %v836_v56, %v879_v46  ;;  %v838_v11 = vpop.f32.mrb[14].mxu0  ;;  %v881_v5 = vpop.f32.mrb[14].mxu1  ;;  %v5500_v56 = vld [vmem:[#allocation19_spill] sm:$0xff] }
 0x1d8   :  { %v894_v57 = vmax.f32 %v886_v62, %v890_v51  ;;  %v892_v15 = vmax.f32 %v838_v11, %v881_v5  ;;  %v840_v58 = vpop.f32.mrb[15].mxu0  ;;  %v883_v12 = vpop.f32.mrb[15].mxu1  ;;  %v4286_v5 = vld [vmem:[%s5288_s0 + $0x50] ss:$8 sps:$4 sm:$0xff]  }
 0x1d9   :  { %v895_v9 = vmax.f32 %v887_v3, %v891_v44  ;;  %v893_v7 = vmax.f32 %v840_v58, %v883_v12  ;;  %v4291_v12 = vld [vmem:[%s5288_s0 + $0x54] ss:$8 sps:$4 sm:$0xff]   ;;  %v5495_v11 = vld [vmem:[#allocation8_spill] sm:$0xff] }
 0x1da   :  { %v898_v4 = vadd.f32 %v894_v57, %v4058_v52  ;;  %v896_v6 = vmax.f32 %v888_v50, %v892_v15  ;;  %1534 = vmatprep.mubr.bf16.mxu1 %v4291_v12  ;;  %v5492_v57 = vld [vmem:[#allocation6_spill] sm:$0xff]  ;;  %v5499_v51 = vld [vmem:[#allocation12_spill] sm:$0xff] }
 0x1db   :  { %v899_v48 = vadd.f32 %v895_v9, %v4065_v49  ;;  %v897_v17 = vmax.f32 %v889_v55, %v893_v7  ;;  %1535 = vmatmul.mubr.bf16.vlgmr.msra.gmra.mrb[24].mxu1 %v4286_v5  ;;  %v5491_v7 = vld [vmem:[#allocation3_spill] sm:$0xff]  ;;  %v5496_v62 = vld [vmem:[#allocation10_spill] sm:$0xff] }
 0x1dc   :  { %v900_v2 = vadd.f32 %v896_v6, %v4058_v52  ;;  %v902_v35 = vmax.f32 %v898_v4, 0.0  ;;  %v4307_v6 = vld [vmem:[%s5289_s4 + $0x14] ss:$8 sps:$4 sm:$0xff]   ;;  %1808 = vmatpush1.bf16.msra.mxu1 %v3804_v16  ;;  %v4318_v4 = vld [vmem:[%s5289_s4 + $0x10] ss:$8 sps:$4 sm:$0xff]  }
 0x1dd   :  { %v901_v1 = vadd.f32 %v897_v17, %v4065_v49  ;;  %v903_v50 = vmax.f32 %v899_v48, 0.0  ;;  %1809 = vmatprep.subr.bf16.mxu1 %v3817_v18  ;;  %v4324_v16 = vld [vmem:[%s5289_s4 + $0x24] ss:$8 sps:$4 sm:$0xff]   ;;  %v4332_v18 = vld [vmem:[%s5289_s4 + $0x20] ss:$8 sps:$4 sm:$0xff]  }
 0x1de   :  { %v904_v46 = vmax.f32 %v900_v2, 0.0  ;;  %v4301_v2 = vld [vmem:[%s5289_s4] ss:$8 sps:$4 sm:$0xff]   ;;  %v4478_v44 = vld [vmem:[%s5289_s4 + $0xd4] ss:$8 sps:$4 sm:$0xff]  }
 0x1df   :  { %v905_v15 = vmax.f32 %v901_v1, 0.0  ;;  %v4472_v3 = vld [vmem:[%s5289_s4 + $0xc0] ss:$8 sps:$4 sm:$0xff]   ;;  %5498 = vst [vmem:[#allocation10_spill] sm:$0xff] %v4478_v44  ;;  %v4486_v58 = vld [vmem:[%s5289_s4 + $0xd0] ss:$8 sps:$4 sm:$0xff]  }
 0x1e0   :  { %v4293_v9 = vpack.c.bf16 %v904_v46, %v902_v35  ;;  %1810 = vmatpush1.bf16.msra.mxu1 %v3824_v19  ;;  %v4346_v19 = vld [vmem:[%s5289_s4 + $0x30] ss:$8 sps:$4 sm:$0xff]   ;;  %5497 = vst [vmem:[#allocation8_spill] sm:$0xff] %v4472_v3  ;;  %5501 = vst [vmem:[#allocation12_spill] sm:$0xff] %v4486_v58  ;;  %v4494_v17 = vld [vmem:[%s5289_s4 + $0xe4] ss:$8 sps:$4 sm:$0xff]  }
 0x1e1   :  { %v4296_v55 = vpack.c.bf16 %v905_v15, %v903_v50  ;;  %1811 = vmatprep.subr.bf16.mxu1 %v3831_v20  ;;  %v4352_v20 = vld [vmem:[%s5289_s4 + $0x44] ss:$8 sps:$4 sm:$0xff]   ;;  %5502 = vst [vmem:[#allocation19_spill] sm:$0xff] %v4494_v17  ;;  %v4508_v50 = vld [vmem:[%s5289_s4 + $0xe0] ss:$8 sps:$4 sm:$0xff]  }
 0x1e2   :  { %5486 = vst [vmem:[#allocation41_spill] sm:$0xff] %v4293_v9  ;;  %5503 = vst [vmem:[#allocation46_spill] sm:$0xff] %v4508_v50  ;;  %v4514_v15 = vld [vmem:[%s5289_s4 + $0xf4] ss:$8 sps:$4 sm:$0xff]  }
 0x1e3   :  { %1133 = vmatprep.mubr.bf16.mxu0 %v4296_v55  ;;  %5504 = vst [vmem:[#allocation47_spill] sm:$0xff] %v4514_v15 }
 0x1e4   :  { %1134 = vmatmul.mubr.bf16.vlgmr.msra.gmra.mrb[16].mxu0 %v4293_v9  ;;  %1812 = vmatpush1.bf16.msra.mxu1 %v3838_v21  ;;  %v4360_v21 = vld [vmem:[%s5289_s4 + $0x40] ss:$8 sps:$4 sm:$0xff]  }
 0x1e5   :  { %1305 = vmatpush1.bf16.msra.mxu0 %v4301_v2  ;;  %1336 = vmatprep.mubr.bf16.mxu0 %v4152_v45  ;;  %v4338_v45 = vld [vmem:[%s5289_s4 + $0x34] ss:$8 sps:$4 sm:$0xff]   ;;  %v4671_v9 = vld [vmem:[%s5287_s2 + $0x160] ss:$16 sps:$4 sm:$0xff]  }
 0x1e6   :  { %1306 = vmatprep.subr.bf16.mxu0 %v4307_v6  ;;  %1813 = vmatprep.subr.bf16.mxu1 %v3845_v22  ;;  %v4366_v22 = vld [vmem:[%s5289_s4 + $0x54] ss:$8 sps:$4 sm:$0xff]   ;;  %5512 = vst [vmem:[#allocation55_spill] sm:$0xff] %v4671_v9 }
 0x1e8   :  { %1814 = vmatpush1.bf16.msra.mxu1 %v3852_v23  ;;  %v4374_v23 = vld [vmem:[%s5289_s4 + $0x50] ss:$8 sps:$4 sm:$0xff]  }
 0x1e9   :  { %1307 = vmatpush1.bf16.msra.mxu0 %v4318_v4  ;;  %1815 = vmatprep.subr.bf16.mxu1 %v3859_v24  ;;  %v4380_v24 = vld [vmem:[%s5289_s4 + $0x64] ss:$8 sps:$4 sm:$0xff]  }
 0x1ea   :  { %1308 = vmatprep.subr.bf16.mxu0 %v4324_v16 }
 0x1ec   :  { %1816 = vmatpush1.bf16.msra.mxu1 %v3866_v25  ;;  %v4388_v25 = vld [vmem:[%s5289_s4 + $0x60] ss:$8 sps:$4 sm:$0xff]  }
 0x1ed   :  { %1309 = vmatpush1.bf16.msra.mxu0 %v4332_v18  ;;  %1817 = vmatprep.subr.bf16.mxu1 %v3873_v26  ;;  %v4394_v26 = vld [vmem:[%s5289_s4 + $0x74] ss:$8 sps:$4 sm:$0xff]  }
 0x1ee   :  { %1310 = vmatprep.subr.bf16.mxu0 %v4338_v45 }
 0x1f0   :  { %1818 = vmatpush1.bf16.msra.mxu1 %v3879_v27  ;;  %v4402_v27 = vld [vmem:[%s5289_s4 + $0x70] ss:$8 sps:$4 sm:$0xff]  }
 0x1f1   :  { %1311 = vmatpush1.bf16.msra.mxu0 %v4346_v19  ;;  %1819 = vmatprep.subr.bf16.mxu1 %v3884_v28  ;;  %v4408_v28 = vld [vmem:[%s5289_s4 + $0x84] ss:$8 sps:$4 sm:$0xff]  }
 0x1f2   :  { %1312 = vmatprep.subr.bf16.mxu0 %v4352_v20 }
 0x1f4   :  { %1820 = vmatpush1.bf16.msra.mxu1 %v3893_v29  ;;  %v4416_v29 = vld [vmem:[%s5289_s4 + $0x80] ss:$8 sps:$4 sm:$0xff]  }
 0x1f5   :  { %1313 = vmatpush1.bf16.msra.mxu0 %v4360_v21  ;;  %1821 = vmatprep.subr.bf16.mxu1 %v3898_v30  ;;  %v4422_v30 = vld [vmem:[%s5289_s4 + $0x94] ss:$8 sps:$4 sm:$0xff]  }
 0x1f6   :  { %1314 = vmatprep.subr.bf16.mxu0 %v4366_v22 }
 0x1f8   :  { %1822 = vmatpush1.bf16.msra.mxu1 %v3907_v31  ;;  %v4430_v31 = vld [vmem:[%s5289_s4 + $0x90] ss:$8 sps:$4 sm:$0xff]  }
 0x1f9   :  { %1315 = vmatpush1.bf16.msra.mxu0 %v4374_v23  ;;  %1823 = vmatprep.subr.bf16.mxu1 %v3912_v32  ;;  %5487 = vst [vmem:[#allocation42_spill] sm:$0xff] %v4430_v31  ;;  %v4436_v32 = vld [vmem:[%s5289_s4 + $0xa4] ss:$8 sps:$4 sm:$0xff]  }
 0x1fa   :  { %1316 = vmatprep.subr.bf16.mxu0 %v4380_v24  ;;  %5488 = vst [vmem:[#allocation43_spill] sm:$0xff] %v4436_v32 }
 0x1fc   :  { %1824 = vmatpush1.bf16.msra.mxu1 %v3921_v33  ;;  %v4444_v33 = vld [vmem:[%s5289_s4 + $0xa0] ss:$8 sps:$4 sm:$0xff]  }
 0x1fd   :  { %1317 = vmatpush1.bf16.msra.mxu0 %v4388_v25  ;;  %1825 = vmatprep.subr.bf16.mxu1 %v3926_v34  ;;  %5489 = vst [vmem:[#allocation44_spill] sm:$0xff] %v4444_v33  ;;  %v4450_v34 = vld [vmem:[%s5289_s4 + $0xb4] ss:$8 sps:$4 sm:$0xff]  }
 0x1fe   :  { %1318 = vmatprep.subr.bf16.mxu0 %v4394_v26  ;;  %5490 = vst [vmem:[#allocation45_spill] sm:$0xff] %v4450_v34 }
 0x200   :  { %1826 = vmatpush1.bf16.msra.mxu1 %v3940_v36  ;;  %v4458_v36 = vld [vmem:[%s5289_s4 + $0xb0] ss:$8 sps:$4 sm:$0xff]  }
 0x201   :  { %1319 = vmatpush1.bf16.msra.mxu0 %v4402_v27  ;;  %1827 = vmatprep.subr.bf16.mxu1 %v3945_v37  ;;  %5493 = vst [vmem:[#allocation3_spill] sm:$0xff] %v4458_v36  ;;  %v4464_v37 = vld [vmem:[%s5289_s4 + $0xc4] ss:$8 sps:$4 sm:$0xff]  }
 0x202   :  { %1320 = vmatprep.subr.bf16.mxu0 %v4408_v28  ;;  %5494 = vst [vmem:[#allocation6_spill] sm:$0xff] %v4464_v37 }
 0x204   :  { %1828 = vmatpush1.bf16.msra.mxu1 %v5491_v7  ;;  %v4575_v7 = vld [vmem:[%s5287_s2 + $0x60] ss:$16 sps:$4 sm:$0xff]  }
 0x205   :  { %1321 = vmatpush1.bf16.msra.mxu0 %v4416_v29  ;;  %1829 = vmatprep.subr.bf16.mxu1 %v5492_v57  ;;  %v4581_v57 = vld [vmem:[%s5287_s2 + $0x84] ss:$16 sps:$4 sm:$0xff]  }
 0x206   :  { %1322 = vmatprep.subr.bf16.mxu0 %v4422_v30 }
 0x208   :  { %1830 = vmatpush1.bf16.msra.mxu1 %v5495_v11  ;;  %v4587_v11 = vld [vmem:[%s5287_s2 + $0x80] ss:$16 sps:$4 sm:$0xff]  }
 0x209   :  { %1323 = vmatpush1.bf16.msra.mxu0 %v4430_v31  ;;  %1831 = vmatprep.subr.bf16.mxu1 %v5496_v62  ;;  %v4593_v62 = vld [vmem:[%s5287_s2 + $0xa4] ss:$16 sps:$4 sm:$0xff]  }
 0x20a   :  { %1324 = vmatprep.subr.bf16.mxu0 %v4436_v32 }
 0x20c   :  { %1832 = vmatpush1.bf16.msra.mxu1 %v5499_v51  ;;  %v4599_v51 = vld [vmem:[%s5287_s2 + $0xa0] ss:$16 sps:$4 sm:$0xff]  }
 0x20d   :  { %1325 = vmatpush1.bf16.msra.mxu0 %v4444_v33  ;;  %1833 = vmatprep.subr.bf16.mxu1 %v5500_v56  ;;  %v4605_v56 = vld [vmem:[%s5287_s2 + $0xc4] ss:$16 sps:$4 sm:$0xff]  }
 0x20e   :  { %1326 = vmatprep.subr.bf16.mxu0 %v4450_v34 }
 0x210   :  { %1834 = vmatpush1.bf16.msra.mxu1 %v4063_v8  ;;  %v4522_v8 = vld [vmem:[%s5289_s4 + $0xf0] ss:$8 sps:$4 sm:$0xff]  }
 0x211   :  { %1327 = vmatpush1.bf16.msra.mxu0 %v4458_v36  ;;  %1835 = vmatprep.subr.bf16.mxu1 %v4090_v0  ;;  %5505 = vst [vmem:[#allocation48_spill] sm:$0xff] %v4522_v8  ;;  %v4531_v0 = vld [vmem:[%s5287_s2 + $0x4] ss:$16 sps:$4 sm:$0xff]  }
 0x212   :  { %1328 = vmatprep.subr.bf16.mxu0 %v4464_v37  ;;  %5506 = vst [vmem:[#allocation49_spill] sm:$0xff] %v4531_v0  ;;  %v4709_v37 = vld [vmem:[%s5287_s2 + $0x1a0] ss:$16 sps:$4 sm:$0xff]   ;;  %v4898_v36 = vld [vmem:[%s5289_s4 + $0x2d4] ss:$8 sps:$4 sm:$0xff]  }
 0x213   :  { %5516 = vst [vmem:[#allocation59_spill] sm:$0xff] %v4709_v37  ;;  %5547 = vst [vmem:[#allocation90_spill] sm:$0xff] %v4898_v36 }
 0x214   :  { %1836 = vmatpush1.bf16.msra.mxu1 %v4099_v47  ;;  %v4538_v47 = vld [vmem:[%s5287_s2] ss:$16 sps:$4 sm:$0xff]  }
 0x215   :  { %1329 = vmatpush1.bf16.msra.mxu0 %v4472_v3  ;;  %v4488_v48 = vpop.f32.mrb[16].mxu1  ;;  %1837 = vmatprep.subr.bf16.mxu1 %v4124_v13  ;;  %v4545_v13 = vld [vmem:[%s5287_s2 + $0x24] ss:$16 sps:$4 sm:$0xff]  }
 0x216   :  { %1330 = vmatprep.subr.bf16.mxu0 %v4478_v44  ;;  %v4496_v1 = vpop.f32.mrb[17].mxu1  ;;  %v4717_v44 = vld [vmem:[%s5287_s2 + $0x1c4] ss:$16 sps:$4 sm:$0xff]  }
 0x217   :  { %v4499_v35 = vpop.f32.mrb[18].mxu1  ;;  %5517 = vst [vmem:[#allocation60_spill] sm:$0xff] %v4717_v44 }
 0x218   :  { %v4502_v46 = vpop.f32.mrb[19].mxu1  ;;  %1838 = vmatpush1.bf16.msra.mxu1 %v4129_v60  ;;  %v4551_v60 = vld [vmem:[%s5287_s2 + $0x20] ss:$16 sps:$4 sm:$0xff]  }
 0x219   :  { %1331 = vmatpush1.bf16.msra.mxu0 %v4486_v58  ;;  %1850 = vmatprep.subr.bf16.mxu1 %v4150_v43  ;;  %v4563_v43 = vld [vmem:[%s5287_s2 + $0x40] ss:$16 sps:$4 sm:$0xff]  }
 0x21a   :  { %1332 = vmatprep.subr.bf16.mxu0 %v4494_v17  ;;  %v4735_v17 = vld [vmem:[%s5289_s4 + $0x204] ss:$8 sps:$4 sm:$0xff]  }
 0x21b   :  { %5520 = vst [vmem:[#allocation63_spill] sm:$0xff] %v4735_v17 }
 0x21d   :  { %1333 = vmatpush1.bf16.msra.mxu0 %v4508_v50  ;;  %v4691_v50 = vld [vmem:[%s5287_s2 + $0x1a4] ss:$16 sps:$4 sm:$0xff]  }
 0x21e   :  { %1334 = vmatprep.subr.bf16.mxu0 %v4514_v15  ;;  %5515 = vst [vmem:[#allocation58_spill] sm:$0xff] %v4691_v50 }
 0x221   :  { %1335 = vmatpush1.bf16.msra.mxu0 %v4522_v8  ;;  %v4683_v8 = vld [vmem:[%s5287_s2 + $0x180] ss:$16 sps:$4 sm:$0xff]  }
 0x222   :  { %1459 = vmatprep.subr.bf16.mxu0 %v4531_v0  ;;  %5514 = vst [vmem:[#allocation57_spill] sm:$0xff] %v4683_v8 }
 0x224   :  { %1337 = vmatmul.mubr.bf16.vlgmr.msra.gmra.mrb[16].mxu0 %v4138_v63  ;;  %v4557_v63 = vld [vmem:[%s5287_s2 + $0x44] ss:$16 sps:$4 sm:$0xff]  }
 0x225   :  { %1460 = vmatpush1.bf16.msra.mxu0 %v4538_v47  ;;  %1491 = vmatprep.mubr.bf16.mxu0 %v4291_v12  ;;  %v4569_v12 = vld [vmem:[%s5287_s2 + $0x64] ss:$16 sps:$4 sm:$0xff]  }
 0x226   :  { %1461 = vmatprep.subr.bf16.mxu0 %v4545_v13 }
 0x229   :  { %1462 = vmatpush1.bf16.msra.mxu0 %v4551_v60 }
 0x22a   :  { %1463 = vmatprep.subr.bf16.mxu0 %v4557_v63 }
 0x22d   :  { %1464 = vmatpush1.bf16.msra.mxu0 %v4563_v43 }
 0x22e   :  { %1465 = vmatprep.subr.bf16.mxu0 %v4569_v12 }
 0x231   :  { %1466 = vmatpush1.bf16.msra.mxu0 %v4575_v7 }
 0x232   :  { %1467 = vmatprep.subr.bf16.mxu0 %v4581_v57 }
 0x235   :  { %1468 = vmatpush1.bf16.msra.mxu0 %v4587_v11 }
 0x236   :  { %1469 = vmatprep.subr.bf16.mxu0 %v4593_v62 }
 0x239   :  { %1470 = vmatpush1.bf16.msra.mxu0 %v4599_v51 }
 0x23a   :  { %1471 = vmatprep.subr.bf16.mxu0 %v4605_v56 }
 0x23d   :  { %1472 = vmatpush1.bf16.msra.mxu0 %v4611_v61 }
 0x23e   :  { %1473 = vmatprep.subr.bf16.mxu0 %v4617_v10 }
 0x241   :  { %1474 = vmatpush1.bf16.msra.mxu0 %v4623_v39 }
 0x242   :  { %1475 = vmatprep.subr.bf16.mxu0 %v4629_v14 }
 0x245   :  { %1476 = vmatpush1.bf16.msra.mxu0 %v4635_v41 }
 0x246   :  { %1477 = vmatprep.subr.bf16.mxu0 %v4641_v54 }
 0x249   :  { %1478 = vmatpush1.bf16.msra.mxu0 %v4647_v59 }
 0x24a   :  { %1479 = vmatprep.subr.bf16.mxu0 %v4653_v53 }
 0x24d   :  { %1480 = vmatpush1.bf16.msra.mxu0 %v4659_v42 }
 0x24e   :  { %1481 = vmatprep.subr.bf16.mxu0 %v4665_v40 }
 0x251   :  { %1482 = vmatpush1.bf16.msra.mxu0 %v4671_v9 }
 0x252   :  { %1483 = vmatprep.subr.bf16.mxu0 %v4677_v38 }
 0x255   :  { %1484 = vmatpush1.bf16.msra.mxu0 %v4683_v8  ;;  %v4686_v15 = vpop.f32.mrb[20].mxu1  ;;  %v4723_v8 = vld [vmem:[%s5287_s2 + $0x1c0] ss:$16 sps:$4 sm:$0xff]  }
 0x256   :  { %1485 = vmatprep.subr.bf16.mxu0 %v4691_v50  ;;  %v4696_v58 = vpop.f32.mrb[21].mxu1  ;;  %5518 = vst [vmem:[#allocation61_spill] sm:$0xff] %v4723_v8  ;;  %v5553_v33 = vmax.f32 %v4488_v48, %v4686_v15  ;;  %v5584_v15 = vld [vmem:[#allocation4_spill] sm:$0xff] }
 0x257   :  { %v4700_v3 = vpop.f32.mrb[22].mxu1  ;;  %v5554_v31 = vmax.f32 %v4496_v1, %v4696_v58  ;;  %v5018_v1 = vld [vmem:[%s5288_s0 + $0x60] ss:$8 sps:$4 sm:$0xff]  }
 0x258   :  { %v4704_v38 = vpop.f32.mrb[23].mxu1 }
 0x259   :  { %1486 = vmatpush1.bf16.msra.mxu0 %v4709_v37  ;;  %v4729_v37 = vld [vmem:[%s5287_s2 + $0x1e4] ss:$16 sps:$4 sm:$0xff]  }
 0x25a   :  { %1487 = vmatprep.subr.bf16.mxu0 %v4717_v44  ;;  %5519 = vst [vmem:[#allocation62_spill] sm:$0xff] %v4729_v37  ;;  %v4740_v44 = vld [vmem:[%s5287_s2 + $0x1e0] ss:$16 sps:$4 sm:$0xff]  }
 0x25b   :  { %5521 = vst [vmem:[#allocation64_spill] sm:$0xff] %v4740_v44 }
 0x25d   :  { %1488 = vmatpush1.bf16.msra.mxu0 %v4723_v8  ;;  %v4746_v8 = vld [vmem:[%s5289_s4 + $0x200] ss:$8 sps:$4 sm:$0xff]  }
 0x25e   :  { %1489 = vmatprep.subr.bf16.mxu0 %v4729_v37  ;;  %5522 = vst [vmem:[#allocation65_spill] sm:$0xff] %v4746_v8  ;;  %v4752_v37 = vld [vmem:[%s5289_s4 + $0x214] ss:$8 sps:$4 sm:$0xff]  }
 0x25f   :  { %5523 = vst [vmem:[#allocation66_spill] sm:$0xff] %v4752_v37 }
 0x261   :  { %1490 = vmatpush1.bf16.msra.mxu0 %v4740_v44  ;;  %v4759_v44 = vld [vmem:[%s5289_s4 + $0x210] ss:$8 sps:$4 sm:$0xff]  }
 0x262   :  { %1760 = vmatprep.subr.bf16.mxu0 %v4735_v17  ;;  %5524 = vst [vmem:[#allocation67_spill] sm:$0xff] %v4759_v44  ;;  %v4765_v17 = vld [vmem:[%s5289_s4 + $0x224] ss:$8 sps:$4 sm:$0xff]  }
 0x263   :  { %5525 = vst [vmem:[#allocation68_spill] sm:$0xff] %v4765_v17 }
 0x264   :  { %1492 = vmatmul.mubr.bf16.vlgmr.msra.gmra.mrb[20].mxu0 %v4286_v5  ;;  %v4771_v5 = vld [vmem:[%s5289_s4 + $0x220] ss:$8 sps:$4 sm:$0xff]  }
 0x265   :  { %1761 = vmatpush1.bf16.msra.mxu0 %v4746_v8  ;;  %5526 = vst [vmem:[#allocation69_spill] sm:$0xff] %v4771_v5  ;;  %v4777_v8 = vld [vmem:[%s5289_s4 + $0x234] ss:$8 sps:$4 sm:$0xff]  }
 0x266   :  { %1762 = vmatprep.subr.bf16.mxu0 %v4752_v37  ;;  %5527 = vst [vmem:[#allocation70_spill] sm:$0xff] %v4777_v8  ;;  %v4783_v37 = vld [vmem:[%s5289_s4 + $0x230] ss:$8 sps:$4 sm:$0xff]  }
 0x267   :  { %5528 = vst [vmem:[#allocation71_spill] sm:$0xff] %v4783_v37 }
 0x269   :  { %1763 = vmatpush1.bf16.msra.mxu0 %v4759_v44  ;;  %v4789_v44 = vld [vmem:[%s5289_s4 + $0x244] ss:$8 sps:$4 sm:$0xff]  }
 0x26a   :  { %1764 = vmatprep.subr.bf16.mxu0 %v4765_v17  ;;  %5529 = vst [vmem:[#allocation72_spill] sm:$0xff] %v4789_v44  ;;  %v4795_v17 = vld [vmem:[%s5289_s4 + $0x240] ss:$8 sps:$4 sm:$0xff]  }
 0x26b   :  { %5530 = vst [vmem:[#allocation73_spill] sm:$0xff] %v4795_v17 }
 0x26d   :  { %1765 = vmatpush1.bf16.msra.mxu0 %v4771_v5  ;;  %v4801_v5 = vld [vmem:[%s5289_s4 + $0x254] ss:$8 sps:$4 sm:$0xff]  }
 0x26e   :  { %1766 = vmatprep.subr.bf16.mxu0 %v4777_v8  ;;  %5531 = vst [vmem:[#allocation74_spill] sm:$0xff] %v4801_v5  ;;  %v4807_v8 = vld [vmem:[%s5289_s4 + $0x250] ss:$8 sps:$4 sm:$0xff]  }
 0x26f   :  { %5532 = vst [vmem:[#allocation75_spill] sm:$0xff] %v4807_v8 }
 0x271   :  { %1767 = vmatpush1.bf16.msra.mxu0 %v4783_v37  ;;  %v4813_v37 = vld [vmem:[%s5289_s4 + $0x264] ss:$8 sps:$4 sm:$0xff]  }
 0x272   :  { %1768 = vmatprep.subr.bf16.mxu0 %v4789_v44  ;;  %5533 = vst [vmem:[#allocation76_spill] sm:$0xff] %v4813_v37  ;;  %v4819_v44 = vld [vmem:[%s5289_s4 + $0x260] ss:$8 sps:$4 sm:$0xff]  }
 0x273   :  { %5534 = vst [vmem:[#allocation77_spill] sm:$0xff] %v4819_v44 }
 0x275   :  { %1769 = vmatpush1.bf16.msra.mxu0 %v4795_v17  ;;  %v4825_v17 = vld [vmem:[%s5289_s4 + $0x274] ss:$8 sps:$4 sm:$0xff]  }
 0x276   :  { %1770 = vmatprep.subr.bf16.mxu0 %v4801_v5  ;;  %5535 = vst [vmem:[#allocation78_spill] sm:$0xff] %v4825_v17  ;;  %v4831_v5 = vld [vmem:[%s5289_s4 + $0x270] ss:$8 sps:$4 sm:$0xff]  }
 0x277   :  { %5536 = vst [vmem:[#allocation79_spill] sm:$0xff] %v4831_v5 }
 0x279   :  { %1771 = vmatpush1.bf16.msra.mxu0 %v4807_v8  ;;  %v4837_v8 = vld [vmem:[%s5289_s4 + $0x284] ss:$8 sps:$4 sm:$0xff]  }
 0x27a   :  { %1772 = vmatprep.subr.bf16.mxu0 %v4813_v37  ;;  %5537 = vst [vmem:[#allocation80_spill] sm:$0xff] %v4837_v8  ;;  %v4843_v37 = vld [vmem:[%s5289_s4 + $0x280] ss:$8 sps:$4 sm:$0xff]  }
 0x27b   :  { %5538 = vst [vmem:[#allocation81_spill] sm:$0xff] %v4843_v37 }
 0x27d   :  { %1773 = vmatpush1.bf16.msra.mxu0 %v4819_v44  ;;  %v4849_v44 = vld [vmem:[%s5289_s4 + $0x294] ss:$8 sps:$4 sm:$0xff]  }
 0x27e   :  { %1774 = vmatprep.subr.bf16.mxu0 %v4825_v17  ;;  %5539 = vst [vmem:[#allocation82_spill] sm:$0xff] %v4849_v44  ;;  %v4855_v17 = vld [vmem:[%s5289_s4 + $0x290] ss:$8 sps:$4 sm:$0xff]  }
 0x27f   :  { %5540 = vst [vmem:[#allocation83_spill] sm:$0xff] %v4855_v17 }
 0x281   :  { %1775 = vmatpush1.bf16.msra.mxu0 %v4831_v5  ;;  %v4861_v5 = vld [vmem:[%s5289_s4 + $0x2a4] ss:$8 sps:$4 sm:$0xff]  }
 0x282   :  { %1776 = vmatprep.subr.bf16.mxu0 %v4837_v8  ;;  %5541 = vst [vmem:[#allocation84_spill] sm:$0xff] %v4861_v5  ;;  %v4867_v8 = vld [vmem:[%s5289_s4 + $0x2a0] ss:$8 sps:$4 sm:$0xff]  }
 0x283   :  { %5542 = vst [vmem:[#allocation85_spill] sm:$0xff] %v4867_v8 }
 0x285   :  { %1777 = vmatpush1.bf16.msra.mxu0 %v4843_v37  ;;  %v4873_v37 = vld [vmem:[%s5289_s4 + $0x2b4] ss:$8 sps:$4 sm:$0xff]  }
 0x286   :  { %1778 = vmatprep.subr.bf16.mxu0 %v4849_v44  ;;  %5543 = vst [vmem:[#allocation86_spill] sm:$0xff] %v4873_v37  ;;  %v4879_v44 = vld [vmem:[%s5289_s4 + $0x2b0] ss:$8 sps:$4 sm:$0xff]  }
 0x287   :  { %5544 = vst [vmem:[#allocation87_spill] sm:$0xff] %v4879_v44 }
 0x289   :  { %1779 = vmatpush1.bf16.msra.mxu0 %v4855_v17  ;;  %v4885_v17 = vld [vmem:[%s5289_s4 + $0x2c4] ss:$8 sps:$4 sm:$0xff]  }
 0x28a   :  { %1780 = vmatprep.subr.bf16.mxu0 %v4861_v5  ;;  %5545 = vst [vmem:[#allocation88_spill] sm:$0xff] %v4885_v17  ;;  %v4891_v5 = vld [vmem:[%s5289_s4 + $0x2c0] ss:$8 sps:$4 sm:$0xff]  }
 0x28b   :  { %5546 = vst [vmem:[#allocation89_spill] sm:$0xff] %v4891_v5 }
 0x28d   :  { %1781 = vmatpush1.bf16.msra.mxu0 %v4867_v8 }
 0x28e   :  { %1782 = vmatprep.subr.bf16.mxu0 %v4873_v37 }
 0x291   :  { %1783 = vmatpush1.bf16.msra.mxu0 %v4879_v44  ;;  %v4903_v44 = vld [vmem:[%s5289_s4 + $0x2d0] ss:$8 sps:$4 sm:$0xff]  }
 0x292   :  { %1784 = vmatprep.subr.bf16.mxu0 %v4885_v17  ;;  %5548 = vst [vmem:[#allocation91_spill] sm:$0xff] %v4903_v44  ;;  %v4915_v17 = vld [vmem:[%s5289_s4 + $0x2e0] ss:$8 sps:$4 sm:$0xff]  }
 0x293   :  { %5550 = vst [vmem:[#allocation93_spill] sm:$0xff] %v4915_v17 }
 0x295   :  { %1785 = vmatpush1.bf16.msra.mxu0 %v4891_v5  ;;  %v4910_v5 = vld [vmem:[%s5289_s4 + $0x2e4] ss:$8 sps:$4 sm:$0xff]  }
 0x296   :  { %1786 = vmatprep.subr.bf16.mxu0 %v4898_v36  ;;  %5549 = vst [vmem:[#allocation92_spill] sm:$0xff] %v4910_v5  ;;  %v4922_v36 = vld [vmem:[%s5289_s4 + $0x2f4] ss:$8 sps:$4 sm:$0xff]  }
 0x297   :  { %5551 = vst [vmem:[#allocation94_spill] sm:$0xff] %v4922_v36 }
 0x299   :  { %1787 = vmatpush1.bf16.msra.mxu0 %v4903_v44  ;;  %v4927_v44 = vld [vmem:[%s5289_s4 + $0x2f0] ss:$8 sps:$4 sm:$0xff]  }
 0x29a   :  { %1788 = vmatprep.subr.bf16.mxu0 %v4910_v5  ;;  %5552 = vst [vmem:[#allocation95_spill] sm:$0xff] %v4927_v44 }
 0x29d   :  { %1789 = vmatpush1.bf16.msra.mxu0 %v4915_v17 }
 0x29e   :  { %1790 = vmatprep.subr.bf16.mxu0 %v4922_v36 }
 0x2a1   :  { %1791 = vmatpush1.bf16.msra.mxu0 %v4927_v44 }
 0x2a2   :  { %1909 = vmatprep.subr.bf16.mxu0 %v4531_v0  ;;  %v5555_v0 = vmax.f32 %v4499_v35, %v4700_v3  ;;  %v5579_v3 = vld [vmem:[#allocation61_spill] sm:$0xff]  ;;  %v5582_v35 = vld [vmem:[#allocation48_spill] sm:$0xff] }
 0x2ae   :  { %v1536_v8 = vpop.f32.mrb[24].mxu1 }
 0x2af   :  { %v1538_v50 = vpop.f32.mrb[25].mxu1 }
 0x2b0   :  { %v1540_v9 = vpop.f32.mrb[26].mxu1 }
 0x2b1   :  { %v1542_v37 = vpop.f32.mrb[27].mxu1 }
 0x337   :  { %v1493_v40 = vpop.f32.mrb[20].mxu0 }
 0x338   :  { %v1549_v5 = vmax.f32 %v1493_v40, %v1536_v8  ;;  %v1495_v34 = vpop.f32.mrb[21].mxu0  ;;  %v5585_v8 = vld [vmem:[#allocation49_spill] sm:$0xff] }
 0x339   :  { %v1550_v17 = vmax.f32 %v1495_v34, %v1538_v50  ;;  %v1497_v42 = vpop.f32.mrb[22].mxu0  ;;  %v5556_v50 = vmax.f32 %v4502_v46, %v4704_v38  ;;  %v5557_v38 = vld [vmem:[#allocation50_spill] sm:$0xff]  ;;  %v5583_v46 = vld [vmem:[#allocation64_spill] sm:$0xff] }
 0x33a   :  { %v1553_v53 = vmax.f32 %v5553_v33, %v1549_v5  ;;  %v1551_v32 = vmax.f32 %v1497_v42, %v1540_v9  ;;  %v1499_v59 = vpop.f32.mrb[23].mxu0  ;;  %v5586_v5 = vld [vmem:[#allocation41_spill] sm:$0xff] }
 0x33b   :  { %v1554_v54 = vmax.f32 %v5554_v31, %v1550_v17  ;;  %v1552_v36 = vmax.f32 %v1499_v59, %v1542_v37  ;;  %v5581_v17 = vld [vmem:[#allocation62_spill] sm:$0xff] }
 0x33c   :  { %v1557_v44 = vadd.f32 %v1553_v53, %v4058_v52  ;;  %v1555_v40 = vmax.f32 %v5555_v0, %v1551_v32  ;;  %v5577_v32 = vld [vmem:[#allocation60_spill] sm:$0xff]  ;;  %v5027_v0 = vld [vmem:[%s5288_s0 + $0x74] ss:$8 sps:$4 sm:$0xff]  }
 0x33d   :  { %v1558_v34 = vadd.f32 %v1554_v54, %v4065_v49  ;;  %v1556_v48 = vmax.f32 %v5556_v50, %v1552_v36  ;;  %v4951_v54 = vld [vmem:[%s5288_s0 + $0x64] ss:$8 sps:$4 sm:$0xff]   ;;  %v5578_v36 = vld [vmem:[#allocation46_spill] sm:$0xff]  ;;  %v5589_v50 = vld [vmem:[#allocation9_spill] sm:$0xff] }
 0x33e   :  { %v1559_v42 = vadd.f32 %v1555_v40, %v4058_v52  ;;  %v1561_v33 = vmax.f32 %v1557_v44, 0.0  ;;  %v5580_v44 = vld [vmem:[#allocation47_spill] sm:$0xff]  ;;  %v5587_v40 = vld [vmem:[#allocation5_spill] sm:$0xff] }
 0x33f   :  { %v1560_v9 = vadd.f32 %v1556_v48, %v4065_v49  ;;  %v1562_v31 = vmax.f32 %v1558_v34, 0.0  ;;  %v5588_v34 = vld [vmem:[#allocation7_spill] sm:$0xff] }
 0x340   :  { %v1563_v58 = vmax.f32 %v1559_v42, 0.0  ;;  %v5590_v48 = vld [vmem:[#allocation11_spill] sm:$0xff]  ;;  %v5591_v42 = vld [vmem:[#allocation13_spill] sm:$0xff] }
 0x341   :  { %v1564_v59 = vmax.f32 %v1560_v9, 0.0  ;;  %v5593_v9 = vld [vmem:[#allocation15_spill] sm:$0xff] }
 0x342   :  { %v1565_v37 = vpack.c.bf16 %v1563_v58, %v1561_v33  ;;  %v5610_v33 = vld [vmem:[#allocation33_spill] sm:$0xff]  ;;  %v5611_v58 = vld [vmem:[#allocation34_spill] sm:$0xff] }
 0x343   :  { %v1566_v53 = vpack.c.bf16 %v1564_v59, %v1562_v31  ;;  %v5612_v31 = vld [vmem:[#allocation35_spill] sm:$0xff]  ;;  %v5613_v59 = vld [vmem:[#allocation36_spill] sm:$0xff] }
 0x345   :  { %1792 = vmatprep.mubr.bf16.mxu0 %v1566_v53  ;;  %1839 = vmatprep.mubr.bf16.mxu1 %v1566_v53  ;;  %v5615_v53 = vld [vmem:[#allocation38_spill] sm:$0xff] }
 0x346   :  { %1793 = vmatmul.mubr.bf16.vlgmr.msra.gmra.mrb[16].mxu0 %v1565_v37  ;;  %1840 = vmatmul.mubr.bf16.vlgmr.msra.gmra.mrb[28].mxu1 %v1565_v37  ;;  %v5614_v37 = vld [vmem:[#allocation37_spill] sm:$0xff] }
 0x347   :  { %1851 = vmatpush1.bf16.msra.mxu1 %v4301_v2  ;;  %1910 = vmatpush1.bf16.msra.mxu0 %v4538_v47  ;;  %v5559_v2 = vld [vmem:[#allocation51_spill] sm:$0xff] }
 0x348   :  { %1882 = vmatprep.mubr.bf16.mxu1 %v4296_v55  ;;  %1852 = vmatprep.subr.bf16.mxu1 %v4307_v6  ;;  %v5558_v55 = vld [vmem:[#allocation42_spill] sm:$0xff]  ;;  %v5560_v6 = vld [vmem:[#allocation43_spill] sm:$0xff] }
 0x349   :  { %1911 = vmatprep.subr.bf16.mxu0 %v4545_v13  ;;  %1941 = vmatprep.mubr.bf16.mxu0 %v4951_v54 }
 0x34b   :  { %1853 = vmatpush1.bf16.msra.mxu1 %v4318_v4  ;;  %1912 = vmatpush1.bf16.msra.mxu0 %v4551_v60  ;;  %v5561_v4 = vld [vmem:[#allocation52_spill] sm:$0xff] }
 0x34c   :  { %1854 = vmatprep.subr.bf16.mxu1 %v4324_v16  ;;  %1913 = vmatprep.subr.bf16.mxu0 %v4557_v63  ;;  %v5562_v16 = vld [vmem:[#allocation44_spill] sm:$0xff] }
 0x34f   :  { %1855 = vmatpush1.bf16.msra.mxu1 %v4332_v18  ;;  %1914 = vmatpush1.bf16.msra.mxu0 %v4563_v43  ;;  %v5563_v18 = vld [vmem:[#allocation53_spill] sm:$0xff] }
 0x350   :  { %1856 = vmatprep.subr.bf16.mxu1 %v4338_v45  ;;  %1915 = vmatprep.subr.bf16.mxu0 %v4569_v12  ;;  %v5564_v45 = vld [vmem:[#allocation45_spill] sm:$0xff] }
 0x353   :  { %1857 = vmatpush1.bf16.msra.mxu1 %v4346_v19  ;;  %1916 = vmatpush1.bf16.msra.mxu0 %v4575_v7  ;;  %v5565_v19 = vld [vmem:[#allocation54_spill] sm:$0xff] }
 0x354   :  { %1858 = vmatprep.subr.bf16.mxu1 %v4352_v20  ;;  %1917 = vmatprep.subr.bf16.mxu0 %v4581_v57  ;;  %v5566_v20 = vld [vmem:[#allocation3_spill] sm:$0xff] }
 0x357   :  { %1859 = vmatpush1.bf16.msra.mxu1 %v4360_v21  ;;  %1918 = vmatpush1.bf16.msra.mxu0 %v4587_v11  ;;  %v5567_v21 = vld [vmem:[#allocation55_spill] sm:$0xff] }
 0x358   :  { %1860 = vmatprep.subr.bf16.mxu1 %v4366_v22  ;;  %1919 = vmatprep.subr.bf16.mxu0 %v4593_v62  ;;  %v5568_v22 = vld [vmem:[#allocation6_spill] sm:$0xff] }
 0x35b   :  { %1861 = vmatpush1.bf16.msra.mxu1 %v4374_v23  ;;  %1920 = vmatpush1.bf16.msra.mxu0 %v4599_v51  ;;  %v5569_v23 = vld [vmem:[#allocation56_spill] sm:$0xff] }
 0x35c   :  { %1862 = vmatprep.subr.bf16.mxu1 %v4380_v24  ;;  %1921 = vmatprep.subr.bf16.mxu0 %v4605_v56  ;;  %v5570_v24 = vld [vmem:[#allocation8_spill] sm:$0xff] }
 0x35f   :  { %1863 = vmatpush1.bf16.msra.mxu1 %v4388_v25  ;;  %1922 = vmatpush1.bf16.msra.mxu0 %v4611_v61  ;;  %v5571_v25 = vld [vmem:[#allocation57_spill] sm:$0xff] }
 0x360   :  { %1864 = vmatprep.subr.bf16.mxu1 %v4394_v26  ;;  %1923 = vmatprep.subr.bf16.mxu0 %v4617_v10  ;;  %v5572_v26 = vld [vmem:[#allocation10_spill] sm:$0xff] }
 0x363   :  { %1865 = vmatpush1.bf16.msra.mxu1 %v4402_v27  ;;  %1924 = vmatpush1.bf16.msra.mxu0 %v4623_v39  ;;  %v5573_v27 = vld [vmem:[#allocation58_spill] sm:$0xff] }
 0x364   :  { %1866 = vmatprep.subr.bf16.mxu1 %v4408_v28  ;;  %1925 = vmatprep.subr.bf16.mxu0 %v4629_v14  ;;  %v5574_v28 = vld [vmem:[#allocation12_spill] sm:$0xff] }
 0x367   :  { %1867 = vmatpush1.bf16.msra.mxu1 %v4416_v29  ;;  %1926 = vmatpush1.bf16.msra.mxu0 %v4635_v41  ;;  %v5575_v29 = vld [vmem:[#allocation59_spill] sm:$0xff] }
 0x368   :  { %1868 = vmatprep.subr.bf16.mxu1 %v4422_v30  ;;  %1927 = vmatprep.subr.bf16.mxu0 %v5557_v38  ;;  %v5576_v30 = vld [vmem:[#allocation19_spill] sm:$0xff] }
 0x36b   :  { %1869 = vmatpush1.bf16.msra.mxu1 %v5558_v55  ;;  %1928 = vmatpush1.bf16.msra.mxu0 %v5559_v2  ;;  %v5617_v55 = vld [vmem:[#allocation40_spill] sm:$0xff] }
 0x36c   :  { %1870 = vmatprep.subr.bf16.mxu1 %v5560_v6  ;;  %1929 = vmatprep.subr.bf16.mxu0 %v5561_v4  ;;  %v5618_v6 = vld [vmem:[#allocation63_spill] sm:$0xff] }
 0x36f   :  { %1871 = vmatpush1.bf16.msra.mxu1 %v5562_v16  ;;  %1930 = vmatpush1.bf16.msra.mxu0 %v5563_v18  ;;  %v3083_v16 = vld [vmem:[%s5287_s2 + $0x2c] ss:$16 sps:$4 sm:$0xff]  }
 0x370   :  { %1872 = vmatprep.subr.bf16.mxu1 %v5564_v45  ;;  %1931 = vmatprep.subr.bf16.mxu0 %v5565_v19  ;;  %v5620_v45 = vld [vmem:[#allocation66_spill] sm:$0xff] }
 0x373   :  { %1873 = vmatpush1.bf16.msra.mxu1 %v5566_v20  ;;  %1932 = vmatpush1.bf16.msra.mxu0 %v5567_v21  ;;  %v3085_v20 = vld [vmem:[%s5287_s2 + $0x4c] ss:$16 sps:$4 sm:$0xff]  }
 0x374   :  { %1874 = vmatprep.subr.bf16.mxu1 %v5568_v22  ;;  %1933 = vmatprep.subr.bf16.mxu0 %v5569_v23  ;;  %v5622_v22 = vld [vmem:[#allocation68_spill] sm:$0xff] }
 0x377   :  { %1875 = vmatpush1.bf16.msra.mxu1 %v5570_v24  ;;  %1934 = vmatpush1.bf16.msra.mxu0 %v5571_v25  ;;  %v3087_v24 = vld [vmem:[%s5287_s2 + $0x6c] ss:$16 sps:$4 sm:$0xff]  }
 0x378   :  { %1876 = vmatprep.subr.bf16.mxu1 %v5572_v26  ;;  %1935 = vmatprep.subr.bf16.mxu0 %v5573_v27  ;;  %v5624_v26 = vld [vmem:[#allocation70_spill] sm:$0xff] }
 0x37b   :  { %1877 = vmatpush1.bf16.msra.mxu1 %v5574_v28  ;;  %1936 = vmatpush1.bf16.msra.mxu0 %v5575_v29  ;;  %v3089_v28 = vld [vmem:[%s5287_s2 + $0x8c] ss:$16 sps:$4 sm:$0xff]  }
 0x37c   :  { %1878 = vmatprep.subr.bf16.mxu1 %v5576_v30  ;;  %1937 = vmatprep.subr.bf16.mxu0 %v5577_v32  ;;  %v5626_v30 = vld [vmem:[#allocation72_spill] sm:$0xff] }
 0x37f   :  { %1879 = vmatpush1.bf16.msra.mxu1 %v5578_v36  ;;  %1938 = vmatpush1.bf16.msra.mxu0 %v5579_v3  ;;  %v3091_v36 = vld [vmem:[%s5287_s2 + $0xac] ss:$16 sps:$4 sm:$0xff]  }
 0x380   :  { %1880 = vmatprep.subr.bf16.mxu1 %v5580_v44  ;;  %1939 = vmatprep.subr.bf16.mxu0 %v5581_v17  ;;  %v5628_v44 = vld [vmem:[#allocation74_spill] sm:$0xff] }
 0x383   :  { %1881 = vmatpush1.bf16.msra.mxu1 %v5582_v35  ;;  %1940 = vmatpush1.bf16.msra.mxu0 %v5583_v46  ;;  %v5629_v35 = vld [vmem:[#allocation75_spill] sm:$0xff] }
 0x384   :  { %1952 = vmatprep.subr.bf16.mxu0 %v5584_v15  ;;  %2005 = vmatprep.subr.bf16.mxu1 %v5585_v8  ;;  %v3094_v15 = vld [vmem:[%s5287_s2 + $0xc8] ss:$16 sps:$4 sm:$0xff]   ;;  %v3095_v8 = vld [vmem:[%s5287_s2 + $0xec] ss:$16 sps:$4 sm:$0xff]  }
 0x386   :  { %1883 = vmatmul.mubr.bf16.vlgmr.msra.gmra.mrb[28].mxu1 %v5586_v5  ;;  %1942 = vmatmul.mubr.bf16.vlgmr.msra.gmra.mrb[24].mxu0 %v5018_v1  ;;  %v5632_v5 = vld [vmem:[#allocation78_spill] sm:$0xff] }
 0x387   :  { %1953 = vmatpush1.bf16.msra.mxu0 %v5587_v40  ;;  %2006 = vmatpush1.bf16.msra.mxu1 %v4538_v47  ;;  %v5592_v47 = vld [vmem:[#allocation14_spill] sm:$0xff]  ;;  %v5633_v40 = vld [vmem:[#allocation79_spill] sm:$0xff] }
 0x388   :  { %1954 = vmatprep.subr.bf16.mxu0 %v5588_v34  ;;  %1984 = vmatprep.mubr.bf16.mxu0 %v4951_v54  ;;  %v5616_v54 = vld [vmem:[#allocation39_spill] sm:$0xff]  ;;  %v5634_v34 = vld [vmem:[#allocation80_spill] sm:$0xff] }
 0x389   :  { %2007 = vmatprep.subr.bf16.mxu1 %v4545_v13  ;;  %2037 = vmatprep.mubr.bf16.mxu1 %v5027_v0  ;;  %v5594_v13 = vld [vmem:[#allocation16_spill] sm:$0xff] }
 0x38b   :  { %1955 = vmatpush1.bf16.msra.mxu0 %v5589_v50  ;;  %2008 = vmatpush1.bf16.msra.mxu1 %v4551_v60  ;;  %v5595_v60 = vld [vmem:[#allocation17_spill] sm:$0xff] }
 0x38c   :  { %1956 = vmatprep.subr.bf16.mxu0 %v5590_v48  ;;  %2009 = vmatprep.subr.bf16.mxu1 %v4557_v63  ;;  %v5596_v63 = vld [vmem:[#allocation18_spill] sm:$0xff]  ;;  %v5635_v50 = vld [vmem:[#allocation81_spill] sm:$0xff] }
 0x38d   :  { %v5636_v48 = vld [vmem:[#allocation82_spill] sm:$0xff] }
 0x38f   :  { %1957 = vmatpush1.bf16.msra.mxu0 %v5591_v42  ;;  %2010 = vmatpush1.bf16.msra.mxu1 %v4563_v43  ;;  %v5597_v43 = vld [vmem:[#allocation20_spill] sm:$0xff]  ;;  %v5637_v42 = vld [vmem:[#allocation83_spill] sm:$0xff] }
 0x390   :  { %1958 = vmatprep.subr.bf16.mxu0 %v5592_v47  ;;  %2011 = vmatprep.subr.bf16.mxu1 %v4569_v12  ;;  %v5598_v12 = vld [vmem:[#allocation21_spill] sm:$0xff]  ;;  %v5638_v47 = vld [vmem:[#allocation84_spill] sm:$0xff] }
 0x393   :  { %1959 = vmatpush1.bf16.msra.mxu0 %v5593_v9  ;;  %2012 = vmatpush1.bf16.msra.mxu1 %v4575_v7  ;;  %v5599_v7 = vld [vmem:[#allocation22_spill] sm:$0xff]  ;;  %v5639_v9 = vld [vmem:[#allocation85_spill] sm:$0xff] }
 0x394   :  { %1960 = vmatprep.subr.bf16.mxu0 %v5594_v13  ;;  %2013 = vmatprep.subr.bf16.mxu1 %v4581_v57  ;;  %v5600_v57 = vld [vmem:[#allocation23_spill] sm:$0xff]  ;;  %v5640_v13 = vld [vmem:[#allocation86_spill] sm:$0xff] }
 0x397   :  { %1961 = vmatpush1.bf16.msra.mxu0 %v5595_v60  ;;  %2014 = vmatpush1.bf16.msra.mxu1 %v4587_v11  ;;  %v5601_v11 = vld [vmem:[#allocation24_spill] sm:$0xff]  ;;  %v5641_v60 = vld [vmem:[#allocation87_spill] sm:$0xff] }
 0x398   :  { %1962 = vmatprep.subr.bf16.mxu0 %v5596_v63  ;;  %2015 = vmatprep.subr.bf16.mxu1 %v4593_v62  ;;  %v5602_v62 = vld [vmem:[#allocation25_spill] sm:$0xff]  ;;  %v5642_v63 = vld [vmem:[#allocation88_spill] sm:$0xff] }
 0x39b   :  { %1963 = vmatpush1.bf16.msra.mxu0 %v5597_v43  ;;  %2016 = vmatpush1.bf16.msra.mxu1 %v4599_v51  ;;  %v5603_v51 = vld [vmem:[#allocation26_spill] sm:$0xff]  ;;  %v5643_v43 = vld [vmem:[#allocation89_spill] sm:$0xff] }
 0x39c   :  { %1964 = vmatprep.subr.bf16.mxu0 %v5598_v12  ;;  %2017 = vmatprep.subr.bf16.mxu1 %v4605_v56  ;;  %v5604_v56 = vld [vmem:[#allocation27_spill] sm:$0xff]  ;;  %v5644_v12 = vld [vmem:[#allocation90_spill] sm:$0xff] }
 0x39f   :  { %1965 = vmatpush1.bf16.msra.mxu0 %v5599_v7  ;;  %2018 = vmatpush1.bf16.msra.mxu1 %v4611_v61  ;;  %v5605_v61 = vld [vmem:[#allocation28_spill] sm:$0xff]  ;;  %v5645_v7 = vld [vmem:[#allocation91_spill] sm:$0xff] }
 0x3a0   :  { %1966 = vmatprep.subr.bf16.mxu0 %v5600_v57  ;;  %2019 = vmatprep.subr.bf16.mxu1 %v4617_v10  ;;  %v5606_v10 = vld [vmem:[#allocation29_spill] sm:$0xff]  ;;  %v5646_v57 = vld [vmem:[#allocation92_spill] sm:$0xff] }
 0x3a3   :  { %1967 = vmatpush1.bf16.msra.mxu0 %v5601_v11  ;;  %2020 = vmatpush1.bf16.msra.mxu1 %v4623_v39  ;;  %v5607_v39 = vld [vmem:[#allocation30_spill] sm:$0xff] }
 0x3a4   :  { %1968 = vmatprep.subr.bf16.mxu0 %v5602_v62  ;;  %2021 = vmatprep.subr.bf16.mxu1 %v4629_v14  ;;  %v5608_v14 = vld [vmem:[#allocation31_spill] sm:$0xff] }
 0x3a7   :  { %1969 = vmatpush1.bf16.msra.mxu0 %v5603_v51  ;;  %2022 = vmatpush1.bf16.msra.mxu1 %v4635_v41  ;;  %v5609_v41 = vld [vmem:[#allocation32_spill] sm:$0xff] }
 0x3a8   :  { %1970 = vmatprep.subr.bf16.mxu0 %v5604_v56  ;;  %2023 = vmatprep.subr.bf16.mxu1 %v5557_v38  ;;  %v5096_v38 = vld [vmem:[%s5288_s0 + $0x70] ss:$8 sps:$4 sm:$0xff]  }
 0x3ab   :  { %1971 = vmatpush1.bf16.msra.mxu0 %v5605_v61  ;;  %2024 = vmatpush1.bf16.msra.mxu1 %v5559_v2  ;;  %v3081_v2 = vld [vmem:[%s5287_s2 + $0xc] ss:$16 sps:$4 sm:$0xff]  }
 0x3ac   :  { %1972 = vmatprep.subr.bf16.mxu0 %v5606_v10  ;;  %2025 = vmatprep.subr.bf16.mxu1 %v5561_v4  ;;  %v3082_v4 = vld [vmem:[%s5287_s2 + $0x8] ss:$16 sps:$4 sm:$0xff]  }
 0x3af   :  { %1973 = vmatpush1.bf16.msra.mxu0 %v5607_v39  ;;  %2026 = vmatpush1.bf16.msra.mxu1 %v5563_v18  ;;  %v5619_v18 = vld [vmem:[#allocation65_spill] sm:$0xff] }
 0x3b0   :  { %1974 = vmatprep.subr.bf16.mxu0 %v5608_v14  ;;  %2027 = vmatprep.subr.bf16.mxu1 %v5565_v19  ;;  %v3084_v19 = vld [vmem:[%s5287_s2 + $0x28] ss:$16 sps:$4 sm:$0xff]  }
 0x3b3   :  { %1975 = vmatpush1.bf16.msra.mxu0 %v5609_v41  ;;  %2028 = vmatpush1.bf16.msra.mxu1 %v5567_v21  ;;  %v5621_v21 = vld [vmem:[#allocation67_spill] sm:$0xff] }
 0x3b4   :  { %1976 = vmatprep.subr.bf16.mxu0 %v5610_v33  ;;  %2029 = vmatprep.subr.bf16.mxu1 %v5569_v23  ;;  %v3086_v23 = vld [vmem:[%s5287_s2 + $0x48] ss:$16 sps:$4 sm:$0xff]  }
 0x3b7   :  { %1977 = vmatpush1.bf16.msra.mxu0 %v5611_v58  ;;  %2030 = vmatpush1.bf16.msra.mxu1 %v5571_v25  ;;  %v5623_v25 = vld [vmem:[#allocation69_spill] sm:$0xff] }
 0x3b8   :  { %1978 = vmatprep.subr.bf16.mxu0 %v5612_v31  ;;  %2031 = vmatprep.subr.bf16.mxu1 %v5573_v27  ;;  %v3088_v27 = vld [vmem:[%s5287_s2 + $0x68] ss:$16 sps:$4 sm:$0xff]  }
 0x3bb   :  { %1979 = vmatpush1.bf16.msra.mxu0 %v5613_v59  ;;  %2032 = vmatpush1.bf16.msra.mxu1 %v5575_v29  ;;  %v5625_v29 = vld [vmem:[#allocation71_spill] sm:$0xff] }
 0x3bc   :  { %1980 = vmatprep.subr.bf16.mxu0 %v5614_v37  ;;  %2033 = vmatprep.subr.bf16.mxu1 %v5577_v32  ;;  %v3090_v32 = vld [vmem:[%s5287_s2 + $0x88] ss:$16 sps:$4 sm:$0xff]  }
 0x3bf   :  { %1981 = vmatpush1.bf16.msra.mxu0 %v5615_v53  ;;  %2034 = vmatpush1.bf16.msra.mxu1 %v5579_v3  ;;  %v5627_v3 = vld [vmem:[#allocation73_spill] sm:$0xff] }
 0x3c0   :  { %1982 = vmatprep.subr.bf16.mxu0 %v5616_v54  ;;  %2035 = vmatprep.subr.bf16.mxu1 %v5581_v17  ;;  %v3092_v17 = vld [vmem:[%s5287_s2 + $0xa8] ss:$16 sps:$4 sm:$0xff]  }
 0x3c3   :  { %1983 = vmatpush1.bf16.msra.mxu0 %v5617_v55  ;;  %2036 = vmatpush1.bf16.msra.mxu1 %v5583_v46  ;;  %v5630_v46 = vld [vmem:[#allocation76_spill] sm:$0xff] }
 0x3c4   :  { %2048 = vmatprep.subr.bf16.mxu0 %v3081_v2  ;;  %2113 = vmatprep.subr.bf16.mxu1 %v5618_v6 }
 0x3c6   :  { %1985 = vmatmul.mubr.bf16.vlgmr.msra.gmra.mrb[28].mxu0 %v5018_v1  ;;  %2038 = vmatmul.mubr.bf16.vlgmr.msra.gmra.mrb[32].mxu1 %v5096_v38  ;;  %v3093_v1 = vld [vmem:[%s5287_s2 + $0xcc] ss:$16 sps:$4 sm:$0xff]  }
 0x3c7   :  { %2049 = vmatpush1.bf16.msra.mxu0 %v3082_v4  ;;  %2080 = vmatprep.mubr.bf16.mxu0 %v5027_v0  ;;  %v5631_v0 = vld [vmem:[#allocation77_spill] sm:$0xff] }
 0x3c8   :  { %2050 = vmatprep.subr.bf16.mxu0 %v3083_v16  ;;  %2114 = vmatpush1.bf16.msra.mxu1 %v5619_v18 }
 0x3c9   :  { %2115 = vmatprep.subr.bf16.mxu1 %v5620_v45 }
 0x3cb   :  { %2051 = vmatpush1.bf16.msra.mxu0 %v3084_v19 }
 0x3cc   :  { %2052 = vmatprep.subr.bf16.mxu0 %v3085_v20  ;;  %2116 = vmatpush1.bf16.msra.mxu1 %v5621_v21 }
 0x3cd   :  { %2117 = vmatprep.subr.bf16.mxu1 %v5622_v22 }
 0x3cf   :  { %2053 = vmatpush1.bf16.msra.mxu0 %v3086_v23 }
 0x3d0   :  { %2054 = vmatprep.subr.bf16.mxu0 %v3087_v24  ;;  %2118 = vmatpush1.bf16.msra.mxu1 %v5623_v25 }
 0x3d1   :  { %2119 = vmatprep.subr.bf16.mxu1 %v5624_v26 }
 0x3d3   :  { %2055 = vmatpush1.bf16.msra.mxu0 %v3088_v27 }
 0x3d4   :  { %2056 = vmatprep.subr.bf16.mxu0 %v3089_v28  ;;  %2120 = vmatpush1.bf16.msra.mxu1 %v5625_v29 }
 0x3d5   :  { %2121 = vmatprep.subr.bf16.mxu1 %v5626_v30 }
 0x3d7   :  { %2057 = vmatpush1.bf16.msra.mxu0 %v3090_v32 }
 0x3d8   :  { %2058 = vmatprep.subr.bf16.mxu0 %v3091_v36  ;;  %2122 = vmatpush1.bf16.msra.mxu1 %v5627_v3 }
 0x3d9   :  { %2123 = vmatprep.subr.bf16.mxu1 %v5628_v44 }
 0x3db   :  { %2059 = vmatpush1.bf16.msra.mxu0 %v3092_v17 }
 0x3dc   :  { %2060 = vmatprep.subr.bf16.mxu0 %v3093_v1  ;;  %2124 = vmatpush1.bf16.msra.mxu1 %v5629_v35 }
 0x3dd   :  { %2125 = vmatprep.subr.bf16.mxu1 %v5630_v46 }
 0x3df   :  { %2061 = vmatpush1.bf16.msra.mxu0 %v3094_v15 }
 0x3e0   :  { %2062 = vmatprep.subr.bf16.mxu0 %v3095_v8  ;;  %2126 = vmatpush1.bf16.msra.mxu1 %v5631_v0 }
 0x3e1   :  { %2127 = vmatprep.subr.bf16.mxu1 %v5632_v5 }
 0x3e3   :  { %2063 = vmatpush1.bf16.msra.mxu0 %v5601_v11  ;;  %v5647_v11 = vld [vmem:[#allocation93_spill] sm:$0xff] }
 0x3e4   :  { %2064 = vmatprep.subr.bf16.mxu0 %v5602_v62  ;;  %2128 = vmatpush1.bf16.msra.mxu1 %v5633_v40  ;;  %v5648_v62 = vld [vmem:[#allocation94_spill] sm:$0xff] }
 0x3e5   :  { %2129 = vmatprep.subr.bf16.mxu1 %v5634_v34  ;;  %v3005_v40 = vld [vmem:[%s5291_s6] sm:$0xff]   ;;  %v3006_v34 = vld [vmem:[%s5291_s6 + $0x8] sm:$0xff]  }
 0x3e7   :  { %2065 = vmatpush1.bf16.msra.mxu0 %v5603_v51  ;;  %v5649_v51 = vld [vmem:[#allocation95_spill] sm:$0xff] }
 0x3e8   :  { %2066 = vmatprep.subr.bf16.mxu0 %v5604_v56  ;;  %2130 = vmatpush1.bf16.msra.mxu1 %v5635_v50  ;;  %v3009_v50 = vld [vmem:[%s5291_s6 + $0x20] sm:$0xff]  }
 0x3e9   :  { %2131 = vmatprep.subr.bf16.mxu1 %v5636_v48  ;;  %v3010_v48 = vld [vmem:[%s5292_s7] sm:$0xff]  }
 0x3eb   :  { %2067 = vmatpush1.bf16.msra.mxu0 %v5605_v61 }
 0x3ec   :  { %2068 = vmatprep.subr.bf16.mxu0 %v5606_v10  ;;  %2132 = vmatpush1.bf16.msra.mxu1 %v5637_v42  ;;  %v3011_v42 = vld [vmem:[%s5291_s6 + $0x28] sm:$0xff]  }
 0x3ed   :  { %2133 = vmatprep.subr.bf16.mxu1 %v5638_v47  ;;  %v3012_v47 = vld [vmem:[%s5292_s7 + $0x8] sm:$0xff]  }
 0x3ef   :  { %2069 = vmatpush1.bf16.msra.mxu0 %v5607_v39 }
 0x3f0   :  { %2070 = vmatprep.subr.bf16.mxu0 %v5608_v14  ;;  %2134 = vmatpush1.bf16.msra.mxu1 %v5639_v9  ;;  %v3014_v9 = vld [vmem:[%s5292_s7 + $0x10] sm:$0x1f]  }
 0x3f1   :  { %2135 = vmatprep.subr.bf16.mxu1 %v5640_v13  ;;  %v3097_v13 = vmov 65535  }
 0x3f3   :  { %2071 = vmatpush1.bf16.msra.mxu0 %v5609_v41 }
 0x3f4   :  { %2072 = vmatprep.subr.bf16.mxu0 %v5610_v33  ;;  %2136 = vmatpush1.bf16.msra.mxu1 %v5641_v60  ;;  %v2230_v60 = vsel %vm2228_vm0, 4294967295, %v3097_v13 }
 0x3f5   :  { %2137 = vmatprep.subr.bf16.mxu1 %v5642_v63  ;;  %v3013_v63 = vld [vmem:[%s5291_s6 + $0x30] sm:$0xff]  }
 0x3f7   :  { %2073 = vmatpush1.bf16.msra.mxu0 %v5611_v58 }
 0x3f8   :  { %2074 = vmatprep.subr.bf16.mxu0 %v5612_v31  ;;  %2138 = vmatpush1.bf16.msra.mxu1 %v5643_v43  ;;  %v2231_v43 = vsel %vm2229_vm1, %v2230_v60, 0 }
 0x3f9   :  { %2139 = vmatprep.subr.bf16.mxu1 %v5644_v12  ;;  %v2233_v12 = vand.u32 %v3014_v9, %v2231_v43 }
 0x3fb   :  { %2075 = vmatpush1.bf16.msra.mxu0 %v5613_v59 }
 0x3fc   :  { %2076 = vmatprep.subr.bf16.mxu0 %v5614_v37  ;;  %2140 = vmatpush1.bf16.msra.mxu1 %v5645_v7  ;;  %v3096_v37 = vmov 0.0   ;;  %v3015_v7 = vld [vmem:[%s5293_s1] sm:$0xff]  }
 0x3fd   :  { %2141 = vmatprep.subr.bf16.mxu1 %v5646_v57  ;;  %v3016_v57 = vld [vmem:[%s5291_s6 + $0x38] sm:$0xff]  }
 0x3ff   :  { %2077 = vmatpush1.bf16.msra.mxu0 %v5615_v53 }
 0x400   :  { %2078 = vmatprep.subr.bf16.mxu0 %v5616_v54  ;;  %2142 = vmatpush1.bf16.msra.mxu1 %v5647_v11 }
 0x401   :  { %2143 = vmatprep.subr.bf16.mxu1 %v5648_v62 }
 0x403   :  { %2079 = vmatpush1.bf16.msra.mxu0 %v5617_v55 }
 0x404   :  { %2144 = vmatpush1.bf16.msra.mxu1 %v5649_v51  ;;  %2692 = vmatprep.subr.bf16.mxu0 %v3096_v37 }
 0x405   :  { %2702 = vmatprep.subr.bf16.mxu1 %v3096_v37 }
 0x406   :  { %2081 = vmatmul.mubr.bf16.vlgmr.msra.gmra.mrb[32].mxu0 %v5096_v38 }
 0x407   :  { %2693 = vmatpush3.bf16.msra.mxu0 %v3010_v48  ;;  %2698 = vmatprep.mubr.msk.bf16.mxu0 %vm3098_vm2, %v3096_v37 }
 0x408   :  { %2694 = vmatprep.subr.bf16.mxu0 %v3096_v37 }
 0x40b   :  { %2695 = vmatpush3.bf16.msra.mxu0 %v3012_v47 }
 0x40c   :  { %2696 = vmatprep.subr.bf16.mxu0 %v3096_v37 }
 0x40f   :  { %2697 = vmatpush3.bf16.msra.mxu0 %v2233_v12 }
 0x412   :  { %2699 = vmatmul.mubr.msk.bf16.vlgmr.msra.gmra.mrb[36].mxu0 %vm2224_vm3, %v3015_v7 }
 0x419   :  { %v5198_v56 = vpop.f32.mrb[16].mxu0 }
 0x41a   :  { %v5200_v61 = vpop.f32.mrb[17].mxu0 }
 0x41b   :  { %v2160_v10 = vmax.f32 %v5198_v56, %v5200_v61  ;;  %v5204_v39 = vpop.f32.mrb[18].mxu0  ;;  %v16_v56 = vstv %s5295_s10 }
 0x41c   :  { %v5206_v14 = vpop.f32.mrb[19].mxu0  ;;  %17 = vst [vmem:[#allocation2] sm:$0x1] %v16_v56 }
 0x41d   :  { %v2161_v41 = vmax.f32 %v5204_v39, %v5206_v14 }
 0x459   :  { %v1943_v33 = vpop.f32.mrb[24].mxu0 }
 0x45a   :  { %v1945_v58 = vpop.f32.mrb[25].mxu0 }
 0x45b   :  { %v1947_v31 = vpop.f32.mrb[26].mxu0 }
 0x45c   :  { %v1949_v59 = vpop.f32.mrb[27].mxu0 }
 0x499   :  { %v1986_v53 = vpop.f32.mrb[28].mxu0  ;;  %v2039_v54 = vpop.f32.mrb[32].mxu1 }
 0x49a   :  { %v2091_v38 = vmax.f32 %v1943_v33, %v1986_v53  ;;  %v1988_v55 = vpop.f32.mrb[29].mxu0  ;;  %v2041_v2 = vpop.f32.mrb[33].mxu1 }
 0x49b   :  { %v2092_v6 = vmax.f32 %v1945_v58, %v1988_v55  ;;  %v1990_v4 = vpop.f32.mrb[30].mxu0  ;;  %v2043_v16 = vpop.f32.mrb[34].mxu1  ;;  %v2662_v58 = vld [vmem:[%s5294_s5] ss:$0 sm:$0xff] }
 0x49c   :  { %v2093_v18 = vmax.f32 %v1947_v31, %v1990_v4  ;;  %v1992_v45 = vpop.f32.mrb[31].mxu0  ;;  %v2045_v19 = vpop.f32.mrb[35].mxu1 }
 0x49d   :  { %v2094_v20 = vmax.f32 %v1949_v59, %v1992_v45 }
 0x4d9   :  { %v2082_v21 = vpop.f32.mrb[32].mxu0 }
 0x4da   :  { %v2095_v22 = vmax.f32 %v2039_v54, %v2082_v21  ;;  %v2084_v23 = vpop.f32.mrb[33].mxu0 }
 0x4db   :  { %v2096_v24 = vmax.f32 %v2041_v2, %v2084_v23  ;;  %v2086_v25 = vpop.f32.mrb[34].mxu0 }
 0x4dc   :  { %v2099_v26 = vmax.f32 %v2091_v38, %v2095_v22  ;;  %v2097_v27 = vmax.f32 %v2043_v16, %v2086_v25  ;;  %v2088_v28 = vpop.f32.mrb[35].mxu0  ;;  %v2677_v22 = vld [vmem:[%s5297_s9] ss:$0 sm:$0xff] }
 0x4dd   :  { %v2100_v29 = vmax.f32 %v2092_v6, %v2096_v24  ;;  %v2098_v30 = vmax.f32 %v2045_v19, %v2088_v28 }
 0x4de   :  { %v2103_v32 = vadd.f32 %v2099_v26, %v4058_v52  ;;  %v2101_v36 = vmax.f32 %v2093_v18, %v2097_v27 }
 0x4df   :  { %v2104_v3 = vadd.f32 %v2100_v29, %v4065_v49  ;;  %v2102_v44 = vmax.f32 %v2094_v20, %v2098_v30  ;;  %v2678_v30 = vld [vmem:[#allocation2] ss:$0 sm:$0xff] }
 0x4e0   :  { %v2105_v17 = vadd.f32 %v2101_v36, %v4058_v52  ;;  %v2107_v35 = vmax.f32 %v2103_v32, 0.0  ;;  %v3008_v52 = vld [vmem:[%s5291_s6 + $0x18] sm:$0xff]  }
 0x4e1   :  { %v2106_v1 = vadd.f32 %v2102_v44, %v4065_v49  ;;  %v2108_v15 = vmax.f32 %v2104_v3, 0.0  ;;  %v3007_v49 = vld [vmem:[%s5291_s6 + $0x10] sm:$0xff]  }
 0x4e2   :  { %v2109_v46 = vmax.f32 %v2105_v17, 0.0 }
 0x4e3   :  { %v2110_v8 = vmax.f32 %v2106_v1, 0.0 }
 0x4e4   :  { %v2111_v0 = vpack.c.bf16 %v2109_v46, %v2107_v35 }
 0x4e5   :  { %v2112_v5 = vpack.c.bf16 %v2110_v8, %v2108_v15  ;;  %v2269_v4 = vpop.f32.mrb[36].mxu0 }
 0x4e6   :  { %v2700_v16 = vpop.f32.mrb[37].mxu0 }
 0x4e7   :  { %2145 = vmatprep.mubr.bf16.mxu1 %v2112_v5  ;;  %v2272_v18 = vpop.f32.mrb[38].mxu0 }
 0x4e8   :  { %2146 = vmatmul.mubr.bf16.vlgmr.msra.gmra.mrb[28].mxu1 %v2111_v0  ;;  %v2701_v45 = vpop.f32.mrb[39].mxu0 }
 0x4e9   :  { %2703 = vmatpush3.bf16.msra.mxu1 %v3005_v40  ;;  %2718 = vmatprep.mubr.msk.bf16.mxu1 %vm3098_vm2, %v3096_v37 }
 0x4ea   :  { %2704 = vmatprep.subr.bf16.mxu1 %v3096_v37 }
 0x4ed   :  { %2705 = vmatpush3.bf16.msra.mxu1 %v3006_v34 }
 0x4ee   :  { %2706 = vmatprep.subr.bf16.mxu1 %v3096_v37 }
 0x4f1   :  { %2707 = vmatpush3.bf16.msra.mxu1 %v3007_v49 }
 0x4f2   :  { %2708 = vmatprep.subr.bf16.mxu1 %v3096_v37 }
 0x4f5   :  { %2709 = vmatpush3.bf16.msra.mxu1 %v3008_v52 }
 0x4f6   :  { %2710 = vmatprep.subr.bf16.mxu1 %v3096_v37 }
 0x4f9   :  { %2711 = vmatpush3.bf16.msra.mxu1 %v3009_v50 }
 0x4fa   :  { %2712 = vmatprep.subr.bf16.mxu1 %v3096_v37 }
 0x4fd   :  { %2713 = vmatpush3.bf16.msra.mxu1 %v3011_v42 }
 0x4fe   :  { %2714 = vmatprep.subr.bf16.mxu1 %v3096_v37 }
 0x501   :  { %2715 = vmatpush3.bf16.msra.mxu1 %v3013_v63 }
 0x502   :  { %2716 = vmatprep.subr.bf16.mxu1 %v3096_v37 }
 0x505   :  { %2717 = vmatpush3.bf16.msra.mxu1 %v3016_v57 }
 0x5bb   :  { %v2147_v11 = vpop.f32.mrb[28].mxu1 }
 0x5bc   :  { %v2149_v62 = vpop.f32.mrb[29].mxu1 }
 0x5bd   :  { %v2162_v51 = vmax.f32 %v2147_v11, %v2149_v62  ;;  %v2151_v33 = vpop.f32.mrb[30].mxu1 }
 0x5be   :  { %v2153_v31 = vpop.f32.mrb[31].mxu1 }
 0x5bf   :  { %v2164_v59 = vmax.f32 %v2160_v10, %v2162_v51  ;;  %v2163_v53 = vmax.f32 %v2151_v33, %v2153_v31  ;;  %v2676_v10 = vld [vmem:[%s5296_s8] ss:$0 sm:$0xff] }
 0x5c1   :  { %v2173_v54 = vadd.f32 %v2662_v58, %v2164_v59  ;;  %v2165_v37 = vmax.f32 %v2161_v41, %v2163_v53 }
 0x5c3   :  { %v2174_v38 = vadd.f32 %v2662_v58, %v2165_v37  ;;  %v2175_v55 = vmax.f32 %v2173_v54, 0.0 }
 0x5c5   :  { %v2176_v2 = vmax.f32 %v2174_v38, 0.0 }
 0x5c7   :  { %v2177_v6 = vpack.c.bf16 %v2176_v2, %v2175_v55 }
 0x5c9   :  { %2719 = vmatmul.mubr.bf16.vlgmr.msra.gmra.mrb[36].mxu1 %v2177_v6 }
 0x69c   :  { %v2358_v61 = vpop.f32.mrb[36].mxu1 }
 0x69d   :  { %v2359_v39 = vadd.f32 %v2358_v61, %v2269_v4  ;;  %v2720_v14 = vpop.f32.mrb[37].mxu1 }
 0x69e   :  { %v2361_v41 = vpop.f32.mrb[38].mxu1 }
 0x69f   :  { %v2372_v19 = vadd.f32 %v2676_v10, %v2359_v39  ;;  %v2362_v20 = vadd.f32 %v2361_v41, %v2272_v18  ;;  %v2721_v21 = vpop.f32.mrb[39].mxu1 }
 0x6a1   :  { %v2374_v23 = vmax.f32 %v2372_v19, 0.0  ;;  %v2373_v24 = vadd.f32 %v2676_v10, %v2362_v20 }
 0x6a3   :  { %v2375_v25 = vmax.f32 %v2373_v24, 0.0  ;;  %v2383_v26 = vmul.f32 %v2677_v22, %v2374_v23 }
 0x6a5   :  { %v2386_v27 = vsel %vm2385_vm4, %v2383_v26, 0.0  ;;  %v2384_v28 = vmul.f32 %v2677_v22, %v2375_v25 }
 0x6a6   :  { %2387 = vadd.xlane.f32.xlu0 %v2386_v27 }
 0x6a7   :  { %v2389_v29 = vsel %vm2385_vm4, %v2384_v28, 0.0 }
 0x6aa   :  { %2390 = vadd.xlane.f32.xlu0 %v2389_v29 }
 0x733   :  { %v2388_v32 = vpop.xlane.xlu0 %2387 }
 0x734   :  { %v2399_v36 = vadd.f32 %v2678_v30, %v2388_v32 }
 0x736   :  { %2402 = vst.msk [vmem:[%s5298_s11] sm:$0xff] %vm2401_vm5, %v2399_v36 }
 0x737   :  { %v2391_v3 = vpop.xlane.xlu0 %2390 }
 0x738   :  { %v2400_v44 = vadd.f32 %v2678_v30, %v2391_v3 }
 0x73a   :  { %2403 = vst.msk [vmem:[%s5298_s11 + $0x8] sm:$0xff] %vm2401_vm5, %v2400_v44 }

</bundles_post_ra>
